<compile_context>
chip_gen: v6e
topology: v6e:2x2x1
jax: 0.10.0
libtpu: 0.0.40
codegen_flags: <defaults>
</compile_context>

<pallas_src>
import functools

import jax
import jax.numpy as jnp
from jax import lax
from jax.experimental import pallas as pl
from jax.experimental.pallas import tpu as pltpu

_EPS = 1e-12


def _normalize_cols(x):
    """L2-normalize each column (spatial position) of a (C, N) feature block."""
    ssq = jnp.sum(x * x, axis=0, keepdims=True)      # (1, N): cheap sublane reduce
    return x * lax.rsqrt(ssq + _EPS)


def _sdcos_kernel(xs_ref, xt_ref, out_ref, *, tm, n_valid, n_pad):
    """One (tm, n_pad) row-slice of both attention graphs + partial SSE.

    xs_ref, xt_ref : (C_pad, N_pad) lane-dense features, resident in VMEM.
    out_ref        : (1, 1) SMEM partial sum of squared differences (this block).
    """
    i = pl.program_id(0)
    start = pl.multiple_of(i * tm, tm)

    # Row-normalized features: cosine similarity == Gram matrix of x_hat, the
    # diagonal (row max) is exactly 1, so no N^2 divide / row-max is needed.
    xs_all = _normalize_cols(xs_ref[...])
    xt_all = _normalize_cols(xt_ref[...])
    xs_blk = _normalize_cols(xs_ref[:, pl.ds(start, tm)])
    xt_blk = _normalize_cols(xt_ref[:, pl.ds(start, tm)])

    dn = (((0,), (0,)), ((), ()))  # contract over the channel axis of both operands
    cos_s = lax.dot_general(xs_blk, xs_all, dn, preferred_element_type=jnp.float32)
    cos_t = lax.dot_general(xt_blk, xt_all, dn, preferred_element_type=jnp.float32)

    p_s = jnp.exp(cos_s - 1.0)
    p_t = jnp.exp(cos_t - 1.0)

    if n_valid < n_pad:  # static branch: only emit masking when N was padded
        col = lax.broadcasted_iota(jnp.int32, (tm, n_pad), 1)
        valid = col < n_valid
        p_s = jnp.where(valid, p_s, 0.0)
        p_t = jnp.where(valid, p_t, 0.0)

    attn_s = p_s * pl.reciprocal(jnp.sum(p_s, axis=-1, keepdims=True), approx=True)
    attn_t = p_t * pl.reciprocal(jnp.sum(p_t, axis=-1, keepdims=True), approx=True)

    d = attn_s - attn_t
    out_ref[0, 0] = jnp.sum(d * d)


def _pad_features(x):
    """(C, W, H) -> zero-padded, lane-dense (C_pad, N_pad) float32, plus N, N_pad."""
    c, w, h = x.shape
    n = w * h
    x2 = x.reshape(c, n).astype(jnp.float32)      # matches torch x.view(C, N)
    c_pad = ((c + 7) // 8) * 8
    n_pad = ((n + 127) // 128) * 128
    x2 = jnp.pad(x2, ((0, c_pad - c), (0, n_pad - n)))
    return x2, n, n_pad


def criterion_sdcos(preds, soft, *, pred_p=1, soft_p=1):
    """JAX/Pallas equivalent of CriterionSDcos.forward(preds, soft).

    preds, soft: sequences of arrays with shape (C, W, H) (PyTorch CHW layout).
    Returns a scalar float32 loss.
    """
    xs = preds[pred_p]   # (Cs, W, H)
    xt = soft[soft_p]    # (Ct, W, H)
    assert xs.shape[1:] == xt.shape[1:], "spatial dims of student/teacher must match"

    xs2, n, n_pad = _pad_features(xs)
    xt2, _, _ = _pad_features(xt)

    # Row-block tile: largest of {512, 256, 128} dividing N_pad while keeping the
    # per-step (TM, N_pad) f32 working set comfortably under the v7x 64 MiB VMEM.
    tm = 128
    for cand in (512, 256):
        if n_pad % cand == 0 and 10 * cand * n_pad * 4 <= 24 * 1024 * 1024:
            tm = cand
            break
    num_blocks = n_pad // tm

    kernel = functools.partial(_sdcos_kernel, tm=tm, n_valid=n, n_pad=n_pad)

    # Rough VMEM need: resident features + ~10 live (TM, N_pad) f32 temporaries.
    vmem_est = (xs2.size + xt2.size + 10 * tm * n_pad) * 4 + (1 << 20)
    vmem_limit = int(min(max(vmem_est, 16 << 20), 56 << 20))

    partials = pl.pallas_call(
        kernel,
        out_shape=jax.ShapeDtypeStruct((num_blocks, 1), jnp.float32),
        grid=(num_blocks,),
        in_specs=[
            pl.BlockSpec(xs2.shape, lambda i: (0, 0)),   # full features, resident
            pl.BlockSpec(xt2.shape, lambda i: (0, 0)),
        ],
        out_specs=pl.BlockSpec((1, 1), lambda i: (i, 0), memory_space=pltpu.SMEM),
        compiler_params=pltpu.CompilerParams(
            dimension_semantics=("parallel",),
            vmem_limit_bytes=vmem_limit,
        ),
    )(xs2, xt2)

    # Padded rows/cols contribute exactly 0; normalize by the true N*N.
    return jnp.sum(partials) / jnp.float32(n * n)


def _reference(preds, soft, pred_p=1, soft_p=1):
    """Pure-JAX reference mirroring the PyTorch module."""
    def attn(x):
        C, W, H = x.shape
        N = W * H
        pk = x.reshape(1, C, N).astype(jnp.float32)               # (1, C, N)
        pq = jnp.transpose(pk, (0, 2, 1))                         # (1, N, C)
        qn = jnp.linalg.norm(pq, axis=2)                          # (1, N)
        nm = qn[:, :, None] * qn[:, None, :]                      # (1, N, N)
        energy = jnp.einsum('bnc,bcm->bnm', pq, pk)               # (1, N, N)
        return jax.nn.softmax(energy / nm, axis=-1)
    gs = attn(preds[pred_p])
    gt = attn(soft[soft_p])
    return jnp.mean((gs - gt) ** 2)


if __name__ == "__main__":
    key = jax.random.PRNGKey(0)
    k1, k2, k3, k4 = jax.random.split(key, 4)

    # C=4, W=16, H=14 -> N = 224 (deliberately not a multiple of 128 so the
    # lane-padding / column-masking path is exercised and checked).
    C, W, H = 4, 16, 14
    preds = [jax.random.normal(k1, (C, W, H), jnp.float32),
             jax.random.normal(k2, (C, W, H), jnp.float32)]
    soft = [jax.random.normal(k3, (C, W, H), jnp.float32),
            jax.random.normal(k4, (C, W, H), jnp.float32)]

    loss = criterion_sdcos(preds, soft)
    loss = jax.block_until_ready(loss)

    ref = jax.block_until_ready(_reference(preds, soft))
    # Tolerance is loosened (vs 1e-5) because the softmax denominator uses the
    # hardware approximate reciprocal (EUP) per the performance review.
    assert jnp.allclose(loss, ref, rtol=1e-2, atol=1e-8), (loss, ref)

    print("KERNEL_OK")
</pallas_src>

<mosaic_0001>
module attributes {stable_mosaic.version = 11 : i64} {
  func.func @_sdcos_kernel(%arg0: i32, %arg1: memref<8x256xf32, #tpu.memory_space<vmem>>, %arg2: memref<8x256xf32, #tpu.memory_space<vmem>>, %arg3: memref<1x1xf32, #tpu.memory_space<smem>>) attributes {dimension_semantics = [#tpu.dimension_semantics<parallel>], iteration_bounds = array<i64: 1>, scalar_prefetch = 0 : i64, scratch_operands = 0 : i64, tpu.core_type = #tpu.core_type<tc>, window_params = [{pipeline_mode = #tpu.pipeline_mode<synchronous>, transform_indices = @transform_0, window_bounds = array<i64: 8, 256>}, {pipeline_mode = #tpu.pipeline_mode<synchronous>, transform_indices = @transform_1, window_bounds = array<i64: 8, 256>}, {transform_indices = @transform_2, window_bounds = array<i64: 1, 1>}]} {
    %c256_i32 = arith.constant 256 : i32
    %0 = arith.muli %arg0, %c256_i32 : i32
    %1 = tpu.assume_multiple %0, 256 : i32
    %c0 = arith.constant 0 : index
    %c0_0 = arith.constant 0 : index
    %2 = vector.load %arg1[%c0, %c0_0] : memref<8x256xf32, #tpu.memory_space<vmem>>, vector<8x256xf32>
    %3 = arith.mulf %2, %2 : vector<8x256xf32>
    %cst = arith.constant dense<0.000000e+00> : vector<256xf32>
    %4 = vector.multi_reduction <add>, %3, %cst [0] : vector<8x256xf32> to vector<256xf32>
    %5 = vector.shape_cast %4 : vector<256xf32> to vector<1x256xf32>
    %cst_1 = arith.constant 9.99999996E-13 : f32
    %6 = vector.broadcast %cst_1 : f32 to vector<1x256xf32>
    %7 = arith.addf %5, %6 : vector<1x256xf32>
    %8 = math.rsqrt %7 : vector<1x256xf32>
    %9 = vector.broadcast %8 : vector<1x256xf32> to vector<8x256xf32>
    %10 = arith.mulf %2, %9 : vector<8x256xf32>
    %c0_2 = arith.constant 0 : index
    %c0_3 = arith.constant 0 : index
    %11 = vector.load %arg2[%c0_2, %c0_3] : memref<8x256xf32, #tpu.memory_space<vmem>>, vector<8x256xf32>
    %12 = arith.mulf %11, %11 : vector<8x256xf32>
    %cst_4 = arith.constant dense<0.000000e+00> : vector<256xf32>
    %13 = vector.multi_reduction <add>, %12, %cst_4 [0] : vector<8x256xf32> to vector<256xf32>
    %14 = vector.shape_cast %13 : vector<256xf32> to vector<1x256xf32>
    %cst_5 = arith.constant 9.99999996E-13 : f32
    %15 = vector.broadcast %cst_5 : f32 to vector<1x256xf32>
    %16 = arith.addf %14, %15 : vector<1x256xf32>
    %17 = math.rsqrt %16 : vector<1x256xf32>
    %18 = vector.broadcast %17 : vector<1x256xf32> to vector<8x256xf32>
    %19 = arith.mulf %11, %18 : vector<8x256xf32>
    %c0_6 = arith.constant 0 : index
    %20 = arith.index_cast %1 : i32 to index
    %21 = vector.load %arg1[%c0_6, %20] : memref<8x256xf32, #tpu.memory_space<vmem>>, vector<8x256xf32>
    %22 = arith.mulf %21, %21 : vector<8x256xf32>
    %cst_7 = arith.constant dense<0.000000e+00> : vector<256xf32>
    %23 = vector.multi_reduction <add>, %22, %cst_7 [0] : vector<8x256xf32> to vector<256xf32>
    %24 = vector.shape_cast %23 : vector<256xf32> to vector<1x256xf32>
    %cst_8 = arith.constant 9.99999996E-13 : f32
    %25 = vector.broadcast %cst_8 : f32 to vector<1x256xf32>
    %26 = arith.addf %24, %25 : vector<1x256xf32>
    %27 = math.rsqrt %26 : vector<1x256xf32>
    %28 = vector.broadcast %27 : vector<1x256xf32> to vector<8x256xf32>
    %29 = arith.mulf %21, %28 : vector<8x256xf32>
    %c0_9 = arith.constant 0 : index
    %30 = arith.index_cast %1 : i32 to index
    %31 = vector.load %arg2[%c0_9, %30] : memref<8x256xf32, #tpu.memory_space<vmem>>, vector<8x256xf32>
    %32 = arith.mulf %31, %31 : vector<8x256xf32>
    %cst_10 = arith.constant dense<0.000000e+00> : vector<256xf32>
    %33 = vector.multi_reduction <add>, %32, %cst_10 [0] : vector<8x256xf32> to vector<256xf32>
    %34 = vector.shape_cast %33 : vector<256xf32> to vector<1x256xf32>
    %cst_11 = arith.constant 9.99999996E-13 : f32
    %35 = vector.broadcast %cst_11 : f32 to vector<1x256xf32>
    %36 = arith.addf %34, %35 : vector<1x256xf32>
    %37 = math.rsqrt %36 : vector<1x256xf32>
    %38 = vector.broadcast %37 : vector<1x256xf32> to vector<8x256xf32>
    %39 = arith.mulf %31, %38 : vector<8x256xf32>
    %cst_12 = arith.constant dense<0.000000e+00> : vector<256x256xf32>
    %40 = tpu.matmul %29, %10, %cst_12 {dimension_numbers = #tpu.dot_dimension_numbers<[0], [0], [1], [1], [0, 1, 1, 1], [], []>} : vector<8x256xf32>, vector<8x256xf32>, vector<256x256xf32> -> vector<256x256xf32>
    %cst_13 = arith.constant dense<0.000000e+00> : vector<256x256xf32>
    %41 = tpu.matmul %39, %19, %cst_13 {dimension_numbers = #tpu.dot_dimension_numbers<[0], [0], [1], [1], [0, 1, 1, 1], [], []>} : vector<8x256xf32>, vector<8x256xf32>, vector<256x256xf32> -> vector<256x256xf32>
    %cst_14 = arith.constant 1.000000e+00 : f32
    %42 = vector.broadcast %cst_14 : f32 to vector<256x256xf32>
    %43 = arith.subf %40, %42 : vector<256x256xf32>
    %44 = math.exp %43 : vector<256x256xf32>
    %cst_15 = arith.constant 1.000000e+00 : f32
    %45 = vector.broadcast %cst_15 : f32 to vector<256x256xf32>
    %46 = arith.subf %41, %45 : vector<256x256xf32>
    %47 = math.exp %46 : vector<256x256xf32>
    %48 = tpu.iota {dimensions = array<i32: 1>} : vector<256x256xi32>
    %c224_i32 = arith.constant 224 : i32
    %49 = vector.broadcast %c224_i32 : i32 to vector<256x256xi32>
    %50 = arith.cmpi slt, %48, %49 : vector<256x256xi32>
    %cst_16 = arith.constant 0.000000e+00 : f32
    %51 = vector.broadcast %cst_16 : f32 to vector<256x256xf32>
    %52 = arith.select %50, %44, %51 : vector<256x256xi1>, vector<256x256xf32>
    %cst_17 = arith.constant 0.000000e+00 : f32
    %53 = vector.broadcast %cst_17 : f32 to vector<256x256xf32>
    %54 = arith.select %50, %47, %53 : vector<256x256xi1>, vector<256x256xf32>
    %cst_18 = arith.constant dense<0.000000e+00> : vector<256xf32>
    %55 = vector.multi_reduction <add>, %52, %cst_18 [1] : vector<256x256xf32> to vector<256xf32>
    %56 = vector.shape_cast %55 : vector<256xf32> to vector<256x1xf32>
    %57 = tpu.reciprocal %56 {approx = true} : vector<256x1xf32> -> vector<256x1xf32>
    %58 = vector.broadcast %57 : vector<256x1xf32> to vector<256x256xf32>
    %59 = arith.mulf %52, %58 : vector<256x256xf32>
    %cst_19 = arith.constant dense<0.000000e+00> : vector<256xf32>
    %60 = vector.multi_reduction <add>, %54, %cst_19 [1] : vector<256x256xf32> to vector<256xf32>
    %61 = vector.shape_cast %60 : vector<256xf32> to vector<256x1xf32>
    %62 = tpu.reciprocal %61 {approx = true} : vector<256x1xf32> -> vector<256x1xf32>
    %63 = vector.broadcast %62 : vector<256x1xf32> to vector<256x256xf32>
    %64 = arith.mulf %54, %63 : vector<256x256xf32>
    %65 = arith.subf %59, %64 : vector<256x256xf32>
    %66 = arith.mulf %65, %65 : vector<256x256xf32>
    %67 = vector.shape_cast %66 : vector<256x256xf32> to vector<1x256x256xf32>
    %cst_20 = arith.constant dense<0.000000e+00> : vector<1xf32>
    %68 = vector.multi_reduction <add>, %67, %cst_20 [1, 2] : vector<1x256x256xf32> to vector<1xf32>
    %69 = vector.shape_cast %68 : vector<1xf32> to vector<1x1x1xf32>
    %70 = vector.extract %69[0, 0, 0] : f32 from vector<1x1x1xf32>
    %c0_21 = arith.constant 0 : index
    %c0_22 = arith.constant 0 : index
    %71 = memref.load %arg3[%c0_21, %c0_22] : memref<1x1xf32, #tpu.memory_space<smem>>
    memref.store %70, %arg3[%c0_21, %c0_22] : memref<1x1xf32, #tpu.memory_space<smem>>
    return
  }
  func.func @transform_0(%arg0: i32) -> (i32, i32) {
    %c0_i32 = arith.constant 0 : i32
    %c0_i32_0 = arith.constant 0 : i32
    %c0_i32_1 = arith.constant 0 : i32
    return %c0_i32, %c0_i32_0 : i32, i32
  }
  func.func @transform_1(%arg0: i32) -> (i32, i32) {
    %c0_i32 = arith.constant 0 : i32
    %c0_i32_0 = arith.constant 0 : i32
    %c0_i32_1 = arith.constant 0 : i32
    return %c0_i32, %c0_i32_0 : i32, i32
  }
  func.func @transform_2(%arg0: i32) -> (i32, i32) {
    %c0_i32 = arith.constant 0 : i32
    %c0_i32_0 = arith.constant 0 : i32
    return %arg0, %c0_i32 : i32, i32
  }
}

</mosaic_0001>

<bundles_post_ra>
// kernel: tpu_custom_call.1
= control target key start
LH: loop header
LB: loop body
LE: loop exit
PB: predicated region body
PF: predicated region fallthrough
CT: control target
= control target key end

     0   :  { %7 = vsyncpa [#allocation3], 0  ;;  %s3606_s0 = inlined_call_operand.hbm [shape: f32[8,256], index: 0, kind: input, shape index: {}]   ;;  %s3607_s1 = inlined_call_operand.hbm [shape: f32[8,256], index: 1, kind: input, shape index: {}]   ;;  %s3608_s2 = inlined_call_operand.hbm [shape: f32[1,1], index: 2, kind: output, shape index: {}]  }
   0x1   :  { %8 = vsyncpa [#allocation6], 0 }
   0x2   :  { %9 = vsyncpa [#allocation4], 0  ;;  %s2732_s9 = smov [#allocation2]   ;;  %s2733_s11 = smov [#allocation5]  }
   0x3   :  { %s16_s10 = sshll.u32 %s2732_s9, 4  ;;  %s26_s12 = sshll.u32 %s2733_s11, 4  ;;  %s17_s10 = int_to_ptr.vmem [resolvable:$true] %s16_s10  ;;  %s27_s12 = int_to_ptr.vmem [resolvable:$true] %s26_s12 }
   0x4   :  { %s2686_s13 = scalar_lea.vmem %s17_s10, 256  ;;  %p2691_p1 = scmp.lt.s32.totalorder %s17_s10, %s17_s10 }
   0x5   :  { %p2687_p0 = scmp.ne.s32.totalorder %s17_s10, %s2686_s13  ;;  %p2692_p2 = scmp.lt.s32.totalorder %s2686_s13, %s2686_s13 }
   0x7   :  { %p2693_p3 = por %p2692_p2, %p2691_p1 }
   0x9   :  { %p2694_p4 = pnand %p2693_p3, %p2687_p0 }
   0xb   :  { %2697 = shalt.err (!%p2694_p4)
}
   0xc   :  { %19 = dma.hbm_to_vmem [thread:$0]  %s3606_s0, 256, %s17_s10, [#allocation3]  }
   0xd   :  { %s2706_s16 = scalar_lea.vmem %s27_s12, 256  ;;  %p2711_p6 = scmp.lt.s32.totalorder %s27_s12, %s27_s12 }
   0xe   :  { %p2707_p5 = scmp.ne.s32.totalorder %s27_s12, %s2706_s16  ;;  %p2712_p7 = scmp.lt.s32.totalorder %s2706_s16, %s2706_s16 }
  0x10   :  { %p2713_p8 = por %p2712_p7, %p2711_p6 }
  0x12   :  { %p2714_p9 = pnand %p2713_p8, %p2707_p5 }
  0x14   :  { %2717 = shalt.err (!%p2714_p9)
}
  0x15   :  { %29 = dma.hbm_to_vmem [thread:$0]  %s3607_s1, 256, %s27_s12, [#allocation6]  }
  0x16   :  { %2726 = dma.done.wait [#allocation3], 256  }
  0x17   :  { %2727 = vsyncadd [#allocation3], 4294967040 }
  0x18   :  { %2728 = dma.done.wait [#allocation6], 256  }
  0x19   :  { %2729 = vsyncadd [#allocation6], 4294967040  ;;  %v2734_v0 = vmov 0.0   ;;  %v85_v1 = vld [vmem:[#allocation2] sm:$0xff]  ;;  %v86_v2 = vld [vmem:[#allocation2 + $0x8] sm:$0xff]  ;;  %vm195_vm0 = vcmask 64512  }
  0x1a   :  { %356 = vmatprep.mubr.f32.mxu0 %v2734_v0  ;;  %773 = vmatprep.mubr.f32.mxu1 %v2734_v0  ;;  %v109_v3 = vld [vmem:[#allocation5] sm:$0xff]  ;;  %v87_v4 = vmul.f32 %v85_v1, %v85_v1  ;;  %v88_v5 = vmul.f32 %v86_v2, %v86_v2  ;;  %v110_v7 = vld [vmem:[#allocation5 + $0x8] sm:$0xff]  ;;  %s2735_s1 = smov [#allocation7]  }
  0x1b   :  { %v111_v6 = vmul.f32 %v109_v3, %v109_v3  ;;  %v112_v8 = vmul.f32 %v110_v7, %v110_v7 }
  0x1c   :  { %v89_v9 = vrot.slane %v87_v4, 4  ;;  %v95_v10 = vrot.slane %v88_v5, 4 }
  0x1d   :  { %v113_v11 = vrot.slane %v111_v6, 4  ;;  %v119_v12 = vrot.slane %v112_v8, 4 }
  0x1e   :  { %v90_v13 = vadd.f32 %v89_v9, %v87_v4  ;;  %v96_v14 = vadd.f32 %v95_v10, %v88_v5 }
  0x1f   :  { %v114_v15 = vadd.f32 %v113_v11, %v111_v6  ;;  %v120_v16 = vadd.f32 %v119_v12, %v112_v8 }
  0x20   :  { %v91_v17 = vrot.slane %v90_v13, 2  ;;  %v97_v18 = vrot.slane %v96_v14, 2 }
  0x21   :  { %v115_v19 = vrot.slane %v114_v15, 2  ;;  %v121_v20 = vrot.slane %v120_v16, 2 }
  0x22   :  { %v92_v21 = vadd.f32 %v91_v17, %v90_v13  ;;  %v98_v22 = vadd.f32 %v97_v18, %v96_v14 }
  0x23   :  { %v116_v23 = vadd.f32 %v115_v19, %v114_v15  ;;  %v122_v24 = vadd.f32 %v121_v20, %v120_v16 }
  0x24   :  { %v93_v25 = vrot.slane %v92_v21, 1  ;;  %v99_v26 = vrot.slane %v98_v22, 1 }
  0x25   :  { %v117_v27 = vrot.slane %v116_v23, 1  ;;  %v123_v28 = vrot.slane %v122_v24, 1 }
  0x26   :  { %v94_v29 = vadd.f32 %v93_v25, %v92_v21  ;;  %v100_v30 = vadd.f32 %v99_v26, %v98_v22 }
  0x27   :  { %v118_v31 = vadd.f32 %v117_v27, %v116_v23  ;;  %v124_v32 = vadd.f32 %v123_v28, %v122_v24 }
  0x28   :  { %v101_v33 = vadd.f32 1e-12, %v94_v29  ;;  %v102_v34 = vadd.f32 1e-12, %v100_v30 }
  0x29   :  { %v125_v35 = vadd.f32 1e-12, %v118_v31  ;;  %v126_v36 = vadd.f32 1e-12, %v124_v32 }
  0x2a   :  { %2286 = vrsqrt.f32 %v101_v33 }
  0x2b   :  { %2288 = vrsqrt.f32 %v102_v34 }
  0x2c   :  { %2290 = vrsqrt.f32 %v125_v35 }
  0x2d   :  { %2292 = vrsqrt.f32 %v126_v36 }
  0x37   :  { %v2287_v37 = vpop.eup %2286 }
  0x38   :  { %v2289_v38 = vpop.eup %2288  ;;  %v105_v39 = vmul.f32 %v2287_v37, %v85_v1 }
  0x39   :  { %v2291_v40 = vpop.eup %2290  ;;  %v106_v41 = vmul.f32 %v2289_v38, %v86_v2 }
  0x3a   :  { %v2293_v42 = vpop.eup %2292  ;;  %131 = vxpose.xlu0.b32.start.end [1/1] (short) %v105_v39, 128  ;;  %v129_v44 = vmul.f32 %v2291_v40, %v109_v3 }
  0x3b   :  { %163 = vxpose.xlu1.b32.start.end [1/1] (short) %v106_v41, 128  ;;  %322 = vmatprep.subr.mxu0 %v106_v41  ;;  %v130_v43 = vmul.f32 %v2293_v42, %v110_v7 }
  0x3c   :  { %323 = vmatpush1.msra.mxu0 %v105_v39 }
  0x3d   :  { %739 = vmatprep.subr.mxu1 %v130_v43 }
  0x3e   :  { %740 = vmatpush1.msra.mxu1 %v129_v44 }
  0x77   :  { %549 = vxpose.xlu0.b32.start.end [1/1] (short) %v129_v44, 128 }
  0x78   :  { %581 = vxpose.xlu1.b32.start.end [1/1] (short) %v130_v43, 128 }
  0xb6   :  { %v147_v45 = vpop.trf.xlu0 }
  0xb7   :  { %2088 = vmatmul.mubr.msk.f32.vlgmr.msra.gmra.mxu0 %vm195_vm0, %v147_v45  ;;  %v179_v46 = vpop.trf.xlu1 }
  0xb8   :  { %362 = vmatprep.mubr.f32.mxu0 %v2734_v0 }
  0xba   :  { %v148_v47 = vpop.trf.xlu0 }
  0xbb   :  { %2089 = vmatmul.mubr.msk.f32.gmra.mxu0 %vm195_vm0, %v148_v47  ;;  %v180_v48 = vpop.trf.xlu1 }
  0xbc   :  { %368 = vmatprep.mubr.f32.mxu0 %v2734_v0 }
  0xbe   :  { %v149_v49 = vpop.trf.xlu0 }
  0xbf   :  { %2090 = vmatmul.mubr.msk.f32.gmra.mxu0 %vm195_vm0, %v149_v49  ;;  %v181_v51 = vpop.trf.xlu1 }
  0xc0   :  { %374 = vmatprep.mubr.f32.mxu0 %v2734_v0 }
  0xc2   :  { %v150_v50 = vpop.trf.xlu0 }
  0xc3   :  { %2091 = vmatmul.mubr.msk.f32.gmra.mxu0 %vm195_vm0, %v150_v50  ;;  %v182_v53 = vpop.trf.xlu1 }
  0xc4   :  { %380 = vmatprep.mubr.f32.mxu0 %v2734_v0 }
  0xc6   :  { %v151_v52 = vpop.trf.xlu0 }
  0xc7   :  { %2092 = vmatmul.mubr.msk.f32.gmra.mxu0 %vm195_vm0, %v151_v52  ;;  %v183_v56 = vpop.trf.xlu1 }
  0xc8   :  { %386 = vmatprep.mubr.f32.mxu0 %v2734_v0 }
  0xca   :  { %v152_v54 = vpop.trf.xlu0 }
  0xcb   :  { %2093 = vmatmul.mubr.msk.f32.gmra.mxu0 %vm195_vm0, %v152_v54  ;;  %v184_v58 = vpop.trf.xlu1  ;;  %v1350_v54 = vlaneseq }
  0xcc   :  { %392 = vmatprep.mubr.f32.mxu0 %v2734_v0 }
  0xce   :  { %v153_v55 = vpop.trf.xlu0 }
  0xcf   :  { %2094 = vmatmul.mubr.msk.f32.gmra.mxu0 %vm195_vm0, %v153_v55  ;;  %v185_v61 = vpop.trf.xlu1 }
  0xd0   :  { %398 = vmatprep.mubr.f32.mxu0 %v2734_v0 }
  0xd2   :  { %v154_v57 = vpop.trf.xlu0 }
  0xd3   :  { %2095 = vmatmul.mubr.msk.f32.gmra.mxu0 %vm195_vm0, %v154_v57  ;;  %v186_v63 = vpop.trf.xlu1 }
  0xd4   :  { %404 = vmatprep.mubr.f32.mxu0 %v2734_v0 }
  0xd6   :  { %v155_v59 = vpop.trf.xlu0 }
  0xd7   :  { %2096 = vmatmul.mubr.msk.f32.gmra.mxu0 %vm195_vm0, %v155_v59  ;;  %v187_v3 = vpop.trf.xlu1 }
  0xd8   :  { %410 = vmatprep.mubr.f32.mxu0 %v2734_v0 }
  0xda   :  { %v156_v60 = vpop.trf.xlu0 }
  0xdb   :  { %2097 = vmatmul.mubr.msk.f32.gmra.mxu0 %vm195_vm0, %v156_v60  ;;  %v188_v5 = vpop.trf.xlu1 }
  0xdc   :  { %416 = vmatprep.mubr.f32.mxu0 %v2734_v0 }
  0xde   :  { %v157_v62 = vpop.trf.xlu0 }
  0xdf   :  { %2098 = vmatmul.mubr.msk.f32.gmra.mxu0 %vm195_vm0, %v157_v62  ;;  %v189_v8 = vpop.trf.xlu1 }
  0xe0   :  { %422 = vmatprep.mubr.f32.mxu0 %v2734_v0 }
  0xe2   :  { %v158_v1 = vpop.trf.xlu0 }
  0xe3   :  { %2099 = vmatmul.mubr.msk.f32.gmra.mxu0 %vm195_vm0, %v158_v1  ;;  %v190_v10 = vpop.trf.xlu1 }
  0xe4   :  { %428 = vmatprep.mubr.f32.mxu0 %v2734_v0 }
  0xe6   :  { %v159_v2 = vpop.trf.xlu0 }
  0xe7   :  { %2100 = vmatmul.mubr.msk.f32.gmra.mxu0 %vm195_vm0, %v159_v2  ;;  %v191_v13 = vpop.trf.xlu1 }
  0xe8   :  { %434 = vmatprep.mubr.f32.mxu0 %v2734_v0 }
  0xea   :  { %v160_v4 = vpop.trf.xlu0 }
  0xeb   :  { %2101 = vmatmul.mubr.msk.f32.gmra.mxu0 %vm195_vm0, %v160_v4  ;;  %v192_v15 = vpop.trf.xlu1 }
  0xec   :  { %440 = vmatprep.mubr.f32.mxu0 %v2734_v0 }
  0xee   :  { %v161_v6 = vpop.trf.xlu0 }
  0xef   :  { %2102 = vmatmul.mubr.msk.f32.gmra.mxu0 %vm195_vm0, %v161_v6  ;;  %v193_v18 = vpop.trf.xlu1 }
  0xf0   :  { %446 = vmatprep.mubr.f32.mxu0 %v2734_v0 }
  0xf2   :  { %v162_v7 = vpop.trf.xlu0 }
  0xf3   :  { %2103 = vmatmul.mubr.msk.f32.gmra.mxu0 %vm195_vm0, %v162_v7  ;;  %v194_v20 = vpop.trf.xlu1 }
  0xf4   :  { %452 = vmatprep.mubr.f32.mxu0 %v2734_v0 }
  0xf6   :  { %v565_v9 = vpop.trf.xlu0 }
  0xf7   :  { %2104 = vmatmul.mubr.msk.f32.gmra.mxu0 %vm195_vm0, %v179_v46  ;;  %2120 = vmatmul.mubr.msk.f32.vlgmr.msra.gmra.mxu1 %vm195_vm0, %v565_v9  ;;  %v597_v23 = vpop.trf.xlu1 }
  0xf8   :  { %458 = vmatprep.mubr.f32.mxu0 %v2734_v0  ;;  %779 = vmatprep.mubr.f32.mxu1 %v2734_v0 }
  0xfa   :  { %v566_v11 = vpop.trf.xlu0 }
  0xfb   :  { %2105 = vmatmul.mubr.msk.f32.gmra.mxu0 %vm195_vm0, %v180_v48  ;;  %2121 = vmatmul.mubr.msk.f32.gmra.mxu1 %vm195_vm0, %v566_v11  ;;  %v598_v25 = vpop.trf.xlu1 }
  0xfc   :  { %464 = vmatprep.mubr.f32.mxu0 %v2734_v0  ;;  %785 = vmatprep.mubr.f32.mxu1 %v2734_v0 }
  0xfe   :  { %v567_v12 = vpop.trf.xlu0 }
  0xff   :  { %2106 = vmatmul.mubr.msk.f32.gmra.mxu0 %vm195_vm0, %v181_v51  ;;  %2122 = vmatmul.mubr.msk.f32.gmra.mxu1 %vm195_vm0, %v567_v12  ;;  %v599_v28 = vpop.trf.xlu1 }
 0x100   :  { %470 = vmatprep.mubr.f32.mxu0 %v2734_v0  ;;  %791 = vmatprep.mubr.f32.mxu1 %v2734_v0 }
 0x102   :  { %v568_v14 = vpop.trf.xlu0 }
 0x103   :  { %2107 = vmatmul.mubr.msk.f32.gmra.mxu0 %vm195_vm0, %v182_v53  ;;  %2123 = vmatmul.mubr.msk.f32.gmra.mxu1 %vm195_vm0, %v568_v14  ;;  %v600_v30 = vpop.trf.xlu1 }
 0x104   :  { %476 = vmatprep.mubr.f32.mxu0 %v2734_v0  ;;  %797 = vmatprep.mubr.f32.mxu1 %v2734_v0 }
 0x106   :  { %v569_v16 = vpop.trf.xlu0 }
 0x107   :  { %2108 = vmatmul.mubr.msk.f32.gmra.mxu0 %vm195_vm0, %v183_v56  ;;  %2124 = vmatmul.mubr.msk.f32.gmra.mxu1 %vm195_vm0, %v569_v16  ;;  %v601_v33 = vpop.trf.xlu1 }
 0x108   :  { %482 = vmatprep.mubr.f32.mxu0 %v2734_v0  ;;  %803 = vmatprep.mubr.f32.mxu1 %v2734_v0 }
 0x10a   :  { %v570_v17 = vpop.trf.xlu0 }
 0x10b   :  { %2109 = vmatmul.mubr.msk.f32.gmra.mxu0 %vm195_vm0, %v184_v58  ;;  %2125 = vmatmul.mubr.msk.f32.gmra.mxu1 %vm195_vm0, %v570_v17  ;;  %v602_v35 = vpop.trf.xlu1  ;;  %v1351_v58 = vand.u32 127, %v1350_v54 }
 0x10c   :  { %488 = vmatprep.mubr.f32.mxu0 %v2734_v0  ;;  %809 = vmatprep.mubr.f32.mxu1 %v2734_v0 }
 0x10d   :  { %v2889_v1 = vadd.s32 128, %v1351_v58 }
 0x10e   :  { %v571_v19 = vpop.trf.xlu0 }
 0x10f   :  { %2110 = vmatmul.mubr.msk.f32.gmra.mxu0 %vm195_vm0, %v185_v61  ;;  %2126 = vmatmul.mubr.msk.f32.gmra.mxu1 %vm195_vm0, %v571_v19  ;;  %v603_v36 = vpop.trf.xlu1  ;;  %vm1354_vm1 = vcmp.lt.s32.totalorder %v2889_v1, 224 }
 0x110   :  { %494 = vmatprep.mubr.f32.mxu0 %v2734_v0  ;;  %815 = vmatprep.mubr.f32.mxu1 %v2734_v0 }
 0x112   :  { %v572_v21 = vpop.trf.xlu0 }
 0x113   :  { %2111 = vmatmul.mubr.msk.f32.gmra.mxu0 %vm195_vm0, %v186_v63  ;;  %2127 = vmatmul.mubr.msk.f32.gmra.mxu1 %vm195_vm0, %v572_v21  ;;  %v604_v37 = vpop.trf.xlu1 }
 0x114   :  { %500 = vmatprep.mubr.f32.mxu0 %v2734_v0  ;;  %821 = vmatprep.mubr.f32.mxu1 %v2734_v0 }
 0x116   :  { %v573_v22 = vpop.trf.xlu0 }
 0x117   :  { %2112 = vmatmul.mubr.msk.f32.gmra.mxu0 %vm195_vm0, %v187_v3  ;;  %2128 = vmatmul.mubr.msk.f32.gmra.mxu1 %vm195_vm0, %v573_v22  ;;  %v605_v38 = vpop.trf.xlu1 }
 0x118   :  { %506 = vmatprep.mubr.f32.mxu0 %v2734_v0  ;;  %827 = vmatprep.mubr.f32.mxu1 %v2734_v0 }
 0x11a   :  { %v574_v24 = vpop.trf.xlu0 }
 0x11b   :  { %2113 = vmatmul.mubr.msk.f32.gmra.mxu0 %vm195_vm0, %v188_v5  ;;  %2129 = vmatmul.mubr.msk.f32.gmra.mxu1 %vm195_vm0, %v574_v24  ;;  %v606_v39 = vpop.trf.xlu1 }
 0x11c   :  { %512 = vmatprep.mubr.f32.mxu0 %v2734_v0  ;;  %833 = vmatprep.mubr.f32.mxu1 %v2734_v0 }
 0x11e   :  { %v575_v26 = vpop.trf.xlu0 }
 0x11f   :  { %2114 = vmatmul.mubr.msk.f32.gmra.mxu0 %vm195_vm0, %v189_v8  ;;  %2130 = vmatmul.mubr.msk.f32.gmra.mxu1 %vm195_vm0, %v575_v26  ;;  %v607_v40 = vpop.trf.xlu1 }
 0x120   :  { %518 = vmatprep.mubr.f32.mxu0 %v2734_v0  ;;  %839 = vmatprep.mubr.f32.mxu1 %v2734_v0 }
 0x122   :  { %v576_v27 = vpop.trf.xlu0 }
 0x123   :  { %2115 = vmatmul.mubr.msk.f32.gmra.mxu0 %vm195_vm0, %v190_v10  ;;  %2131 = vmatmul.mubr.msk.f32.gmra.mxu1 %vm195_vm0, %v576_v27  ;;  %v608_v41 = vpop.trf.xlu1 }
 0x124   :  { %524 = vmatprep.mubr.f32.mxu0 %v2734_v0  ;;  %845 = vmatprep.mubr.f32.mxu1 %v2734_v0 }
 0x126   :  { %v577_v29 = vpop.trf.xlu0 }
 0x127   :  { %2116 = vmatmul.mubr.msk.f32.gmra.mxu0 %vm195_vm0, %v191_v13  ;;  %2132 = vmatmul.mubr.msk.f32.gmra.mxu1 %vm195_vm0, %v577_v29  ;;  %v609_v42 = vpop.trf.xlu1 }
 0x128   :  { %530 = vmatprep.mubr.f32.mxu0 %v2734_v0  ;;  %851 = vmatprep.mubr.f32.mxu1 %v2734_v0 }
 0x12a   :  { %v578_v31 = vpop.trf.xlu0 }
 0x12b   :  { %2117 = vmatmul.mubr.msk.f32.gmra.mxu0 %vm195_vm0, %v192_v15  ;;  %2133 = vmatmul.mubr.msk.f32.gmra.mxu1 %vm195_vm0, %v578_v31  ;;  %v610_v43 = vpop.trf.xlu1 }
 0x12c   :  { %536 = vmatprep.mubr.f32.mxu0 %v2734_v0  ;;  %857 = vmatprep.mubr.f32.mxu1 %v2734_v0 }
 0x12e   :  { %v579_v32 = vpop.trf.xlu0 }
 0x12f   :  { %2118 = vmatmul.mubr.msk.f32.gmra.mxu0 %vm195_vm0, %v193_v18  ;;  %2134 = vmatmul.mubr.msk.f32.gmra.mxu1 %vm195_vm0, %v579_v32  ;;  %v611_v44 = vpop.trf.xlu1 }
 0x130   :  { %542 = vmatprep.mubr.f32.mxu0 %v2734_v0  ;;  %863 = vmatprep.mubr.f32.mxu1 %v2734_v0 }
 0x132   :  { %v580_v34 = vpop.trf.xlu0 }
 0x133   :  { %2119 = vmatmul.mubr.msk.f32.gmra.mxu0 %vm195_vm0, %v194_v20  ;;  %2135 = vmatmul.mubr.msk.f32.gmra.mxu1 %vm195_vm0, %v580_v34  ;;  %v612_v45 = vpop.trf.xlu1 }
 0x134   :  { %869 = vmatprep.mubr.f32.mxu1 %v2734_v0 }
 0x137   :  { %2136 = vmatmul.mubr.msk.f32.gmra.mxu1 %vm195_vm0, %v597_v23 }
 0x138   :  { %875 = vmatprep.mubr.f32.mxu1 %v2734_v0 }
 0x13b   :  { %2137 = vmatmul.mubr.msk.f32.gmra.mxu1 %vm195_vm0, %v598_v25 }
 0x13c   :  { %881 = vmatprep.mubr.f32.mxu1 %v2734_v0 }
 0x13f   :  { %2138 = vmatmul.mubr.msk.f32.gmra.mxu1 %vm195_vm0, %v599_v28 }
 0x140   :  { %887 = vmatprep.mubr.f32.mxu1 %v2734_v0 }
 0x143   :  { %2139 = vmatmul.mubr.msk.f32.gmra.mxu1 %vm195_vm0, %v600_v30 }
 0x144   :  { %893 = vmatprep.mubr.f32.mxu1 %v2734_v0 }
 0x147   :  { %2140 = vmatmul.mubr.msk.f32.gmra.mxu1 %vm195_vm0, %v601_v33 }
 0x148   :  { %899 = vmatprep.mubr.f32.mxu1 %v2734_v0 }
 0x14b   :  { %2141 = vmatmul.mubr.msk.f32.gmra.mxu1 %vm195_vm0, %v602_v35 }
 0x14c   :  { %905 = vmatprep.mubr.f32.mxu1 %v2734_v0 }
 0x14f   :  { %2142 = vmatmul.mubr.msk.f32.gmra.mxu1 %vm195_vm0, %v603_v36 }
 0x150   :  { %911 = vmatprep.mubr.f32.mxu1 %v2734_v0 }
 0x153   :  { %2143 = vmatmul.mubr.msk.f32.gmra.mxu1 %vm195_vm0, %v604_v37 }
 0x154   :  { %917 = vmatprep.mubr.f32.mxu1 %v2734_v0 }
 0x157   :  { %2144 = vmatmul.mubr.msk.f32.gmra.mxu1 %vm195_vm0, %v605_v38 }
 0x158   :  { %923 = vmatprep.mubr.f32.mxu1 %v2734_v0 }
 0x15b   :  { %2145 = vmatmul.mubr.msk.f32.gmra.mxu1 %vm195_vm0, %v606_v39 }
 0x15c   :  { %929 = vmatprep.mubr.f32.mxu1 %v2734_v0 }
 0x15f   :  { %2146 = vmatmul.mubr.msk.f32.gmra.mxu1 %vm195_vm0, %v607_v40 }
 0x160   :  { %935 = vmatprep.mubr.f32.mxu1 %v2734_v0 }
 0x163   :  { %2147 = vmatmul.mubr.msk.f32.gmra.mxu1 %vm195_vm0, %v608_v41 }
 0x164   :  { %941 = vmatprep.mubr.f32.mxu1 %v2734_v0 }
 0x167   :  { %2148 = vmatmul.mubr.msk.f32.gmra.mxu1 %vm195_vm0, %v609_v42 }
 0x168   :  { %947 = vmatprep.mubr.f32.mxu1 %v2734_v0 }
 0x16b   :  { %2149 = vmatmul.mubr.msk.f32.gmra.mxu1 %vm195_vm0, %v610_v43 }
 0x16c   :  { %953 = vmatprep.mubr.f32.mxu1 %v2734_v0 }
 0x16f   :  { %2150 = vmatmul.mubr.msk.f32.gmra.mxu1 %vm195_vm0, %v611_v44 }
 0x170   :  { %959 = vmatprep.mubr.f32.mxu1 %v2734_v0 }
 0x173   :  { %2151 = vmatmul.mubr.msk.f32.gmra.mxu1 %vm195_vm0, %v612_v45 }
 0x177   :  { %v358_v46 = vpop.f32.mrf.mxu0 }
 0x178   :  { %v2152_v47 = vadd.f32 -1.0, %v358_v46 }
 0x179   :  { %v360_v48 = vpop.f32.mrf.mxu0 }
 0x17a   :  { %v2153_v49 = vadd.f32 -1.0, %v360_v48  ;;  %v1030_v50 = vmul.f32 1.442695, %v2152_v47 }
 0x17b   :  { %v2885_v51 = vpop.f32.mrf.mxu0 }
 0x17c   :  { %v1032_v52 = vmul.f32 1.442695, %v2153_v49 }
 0x17d   :  { %v2887_v53 = vpop.f32.mrf.mxu0 }
 0x17e   :  { %2294 = vpow2.f32 %v1032_v52 }
 0x17f   :  { %2296 = vpow2.f32 %v1030_v50  ;;  %v370_v55 = vpop.f32.mrf.mxu0 }
 0x180   :  { %v2156_v56 = vadd.f32 -1.0, %v370_v55 }
 0x181   :  { %v372_v57 = vpop.f32.mrf.mxu0 }
 0x182   :  { %v2157_v0 = vadd.f32 -1.0, %v372_v57  ;;  %v1038_v59 = vmul.f32 1.442695, %v2156_v56 }
 0x183   :  { %v376_v60 = vpop.f32.mrf.mxu0 }
 0x184   :  { %v1040_v61 = vmul.f32 1.442695, %v2157_v0  ;;  %v2158_v62 = vadd.f32 -1.0, %v376_v60 }
 0x185   :  { %v378_v63 = vpop.f32.mrf.mxu0 }
 0x186   :  { %2298 = vpow2.f32 %v1040_v61  ;;  %v2159_v2 = vadd.f32 -1.0, %v378_v63  ;;  %v1042_v3 = vmul.f32 1.442695, %v2158_v62 }
 0x187   :  { %2300 = vpow2.f32 %v1038_v59  ;;  %v382_v4 = vpop.f32.mrf.mxu0 }
 0x188   :  { %v1044_v5 = vmul.f32 1.442695, %v2159_v2  ;;  %v2160_v6 = vadd.f32 -1.0, %v382_v4 }
 0x189   :  { %v384_v7 = vpop.f32.mrf.mxu0 }
 0x18a   :  { %2302 = vpow2.f32 %v1044_v5  ;;  %v2161_v8 = vadd.f32 -1.0, %v384_v7  ;;  %v1046_v10 = vmul.f32 1.442695, %v2160_v6 }
 0x18b   :  { %v2295_v9 = vpop.eup %2294  ;;  %2304 = vpow2.f32 %v1042_v3  ;;  %v388_v11 = vpop.f32.mrf.mxu0 }
 0x18c   :  { %v2892_v12 = vpop.eup %2296  ;;  %v1048_v13 = vmul.f32 1.442695, %v2161_v8  ;;  %v2162_v14 = vadd.f32 -1.0, %v388_v11  ;;  %v2896_v15 = vsel %vm1354_vm1, %v2295_v9, 0.0 }
 0x18d   :  { %v390_v16 = vpop.f32.mrf.mxu0  ;;  %v1483_v17 = vadd.f32 %v2892_v12, %v2896_v15 }
 0x18e   :  { %2306 = vpow2.f32 %v1048_v13  ;;  %v2163_v18 = vadd.f32 -1.0, %v390_v16  ;;  %v1050_v19 = vmul.f32 1.442695, %v2162_v14 }
 0x18f   :  { %2308 = vpow2.f32 %v1046_v10  ;;  %1484 = vadd.xlane.f32.xlu0 %v1483_v17  ;;  %v394_v20 = vpop.f32.mrf.mxu0 }
 0x190   :  { %v1052_v21 = vmul.f32 1.442695, %v2163_v18  ;;  %v2164_v22 = vadd.f32 -1.0, %v394_v20 }
 0x191   :  { %v396_v23 = vpop.f32.mrf.mxu0 }
 0x192   :  { %2310 = vpow2.f32 %v1052_v21  ;;  %v2165_v24 = vadd.f32 -1.0, %v396_v23  ;;  %v1054_v26 = vmul.f32 1.442695, %v2164_v22 }
 0x193   :  { %v2299_v25 = vpop.eup %2298  ;;  %2312 = vpow2.f32 %v1050_v19  ;;  %v400_v27 = vpop.f32.mrf.mxu0 }
 0x194   :  { %v2900_v28 = vpop.eup %2300  ;;  %v1056_v29 = vmul.f32 1.442695, %v2165_v24  ;;  %v2166_v30 = vadd.f32 -1.0, %v400_v27  ;;  %v2904_v31 = vsel %vm1354_vm1, %v2299_v25, 0.0 }
 0x195   :  { %v402_v32 = vpop.f32.mrf.mxu0  ;;  %v1489_v33 = vadd.f32 %v2900_v28, %v2904_v31 }
 0x196   :  { %2314 = vpow2.f32 %v1056_v29  ;;  %v2167_v34 = vadd.f32 -1.0, %v402_v32  ;;  %v1058_v36 = vmul.f32 1.442695, %v2166_v30 }
 0x197   :  { %v2303_v35 = vpop.eup %2302  ;;  %2316 = vpow2.f32 %v1054_v26  ;;  %1490 = vadd.xlane.f32.xlu0 %v1489_v33  ;;  %v406_v37 = vpop.f32.mrf.mxu0 }
 0x198   :  { %v2908_v38 = vpop.eup %2304  ;;  %v1060_v39 = vmul.f32 1.442695, %v2167_v34  ;;  %v2168_v40 = vadd.f32 -1.0, %v406_v37  ;;  %v2912_v41 = vsel %vm1354_vm1, %v2303_v35, 0.0 }
 0x199   :  { %v408_v42 = vpop.f32.mrf.mxu0  ;;  %v1492_v43 = vadd.f32 %v2908_v38, %v2912_v41 }
 0x19a   :  { %2318 = vpow2.f32 %v1060_v39  ;;  %v2169_v44 = vadd.f32 -1.0, %v408_v42  ;;  %v1062_v46 = vmul.f32 1.442695, %v2168_v40  ;;  %v2154_v40 = vadd.f32 -1.0, %v2885_v51 }
 0x19b   :  { %v2307_v45 = vpop.eup %2306  ;;  %2320 = vpow2.f32 %v1058_v36  ;;  %1493 = vadd.xlane.f32.xlu0 %v1492_v43  ;;  %v412_v47 = vpop.f32.mrf.mxu0 }
 0x19c   :  { %v2916_v48 = vpop.eup %2308  ;;  %v1064_v49 = vmul.f32 1.442695, %v2169_v44  ;;  %v2170_v50 = vadd.f32 -1.0, %v412_v47  ;;  %v2920_v52 = vsel %vm1354_vm1, %v2307_v45, 0.0  ;;  %v2155_v44 = vadd.f32 -1.0, %v2887_v53 }
 0x19d   :  { %v414_v54 = vpop.f32.mrf.mxu0  ;;  %v1495_v55 = vadd.f32 %v2916_v48, %v2920_v52 }
 0x19e   :  { %2322 = vpow2.f32 %v1064_v49  ;;  %v2171_v56 = vadd.f32 -1.0, %v414_v54  ;;  %v1066_v58 = vmul.f32 1.442695, %v2170_v50  ;;  %v1036_v53 = vmul.f32 1.442695, %v2155_v44 }
 0x19f   :  { %v2311_v57 = vpop.eup %2310  ;;  %2324 = vpow2.f32 %v1062_v46  ;;  %1496 = vadd.xlane.f32.xlu0 %v1495_v55  ;;  %v418_v0 = vpop.f32.mrf.mxu0 }
 0x1a0   :  { %v2924_v59 = vpop.eup %2312  ;;  %v1068_v60 = vmul.f32 1.442695, %v2171_v56  ;;  %v2172_v61 = vadd.f32 -1.0, %v418_v0  ;;  %v2928_v62 = vsel %vm1354_vm1, %v2311_v57, 0.0  ;;  %v1034_v56 = vmul.f32 1.442695, %v2154_v40 }
 0x1a1   :  { %v420_v63 = vpop.f32.mrf.mxu0  ;;  %v1498_v2 = vadd.f32 %v2924_v59, %v2928_v62 }
 0x1a2   :  { %2326 = vpow2.f32 %v1068_v60  ;;  %v2173_v3 = vadd.f32 -1.0, %v420_v63  ;;  %v1070_v5 = vmul.f32 1.442695, %v2172_v61 }
 0x1a3   :  { %v2315_v4 = vpop.eup %2314  ;;  %2328 = vpow2.f32 %v1066_v58  ;;  %1499 = vadd.xlane.f32.xlu0 %v1498_v2  ;;  %v424_v6 = vpop.f32.mrf.mxu0 }
 0x1a4   :  { %v2932_v7 = vpop.eup %2316  ;;  %v1072_v8 = vmul.f32 1.442695, %v2173_v3  ;;  %v2936_v9 = vsel %vm1354_vm1, %v2315_v4, 0.0  ;;  %v2174_v10 = vadd.f32 -1.0, %v424_v6 }
 0x1a5   :  { %v426_v11 = vpop.f32.mrf.mxu0  ;;  %v1501_v13 = vadd.f32 %v2932_v7, %v2936_v9 }
 0x1a6   :  { %2330 = vpow2.f32 %v1072_v8  ;;  %v2175_v14 = vadd.f32 -1.0, %v426_v11  ;;  %v1074_v21 = vmul.f32 1.442695, %v2174_v10 }
 0x1a7   :  { %v2319_v16 = vpop.eup %2318  ;;  %2332 = vpow2.f32 %v1070_v5  ;;  %1502 = vadd.xlane.f32.xlu0 %v1501_v13  ;;  %v430_v17 = vpop.f32.mrf.mxu0 }
 0x1a8   :  { %v2940_v18 = vpop.eup %2320  ;;  %v1076_v19 = vmul.f32 1.442695, %v2175_v14  ;;  %v2944_v20 = vsel %vm1354_vm1, %v2319_v16, 0.0  ;;  %v2176_v22 = vadd.f32 -1.0, %v430_v17 }
 0x1a9   :  { %v432_v23 = vpop.f32.mrf.mxu0  ;;  %v1504_v24 = vadd.f32 %v2940_v18, %v2944_v20 }
 0x1aa   :  { %2334 = vpow2.f32 %v1076_v19  ;;  %v2177_v25 = vadd.f32 -1.0, %v432_v23  ;;  %v1078_v33 = vmul.f32 1.442695, %v2176_v22 }
 0x1ab   :  { %v2323_v26 = vpop.eup %2322  ;;  %1505 = vadd.xlane.f32.xlu0 %v1504_v24  ;;  %v436_v27 = vpop.f32.mrf.mxu0  ;;  %2336 = vpow2.f32 %v1074_v21 }
 0x1ac   :  { %v2948_v29 = vpop.eup %2324  ;;  %v1080_v30 = vmul.f32 1.442695, %v2177_v25  ;;  %v2952_v32 = vsel %vm1354_vm1, %v2323_v26, 0.0  ;;  %v2178_v34 = vadd.f32 -1.0, %v436_v27 }
 0x1ad   :  { %v438_v35 = vpop.f32.mrf.mxu0  ;;  %v1507_v36 = vadd.f32 %v2948_v29, %v2952_v32 }
 0x1ae   :  { %2338 = vpow2.f32 %v1080_v30  ;;  %v2179_v37 = vadd.f32 -1.0, %v438_v35  ;;  %v1082_v47 = vmul.f32 1.442695, %v2178_v34 }
 0x1af   :  { %v2327_v39 = vpop.eup %2326  ;;  %1508 = vadd.xlane.f32.xlu0 %v1507_v36  ;;  %v442_v42 = vpop.f32.mrf.mxu0  ;;  %2340 = vpow2.f32 %v1078_v33 }
 0x1b0   :  { %v2957_v43 = vpop.eup %2328  ;;  %v1084_v45 = vmul.f32 1.442695, %v2179_v37  ;;  %v2962_v46 = vsel %vm1354_vm1, %v2327_v39, 0.0  ;;  %v2180_v49 = vadd.f32 -1.0, %v442_v42 }
 0x1b1   :  { %3695 = vst [vmem:[#allocation11_spill] sm:$0xff] %v2962_v46  ;;  %v444_v50 = vpop.f32.mrf.mxu0  ;;  %v1510_v54 = vadd.f32 %v2957_v43, %v2962_v46 }
 0x1b2   :  { %2342 = vpow2.f32 %v1084_v45  ;;  %v2181_v51 = vadd.f32 -1.0, %v444_v50  ;;  %v1086_v63 = vmul.f32 1.442695, %v2180_v49 }
 0x1b3   :  { %v2331_v55 = vpop.eup %2330  ;;  %1511 = vadd.xlane.f32.xlu0 %v1510_v54  ;;  %v448_v57 = vpop.f32.mrf.mxu0  ;;  %2344 = vpow2.f32 %v1082_v47 }
 0x1b4   :  { %v2966_v58 = vpop.eup %2332  ;;  %v1088_v0 = vmul.f32 1.442695, %v2181_v51  ;;  %v2182_v60 = vadd.f32 -1.0, %v448_v57  ;;  %v2970_v61 = vsel %vm1354_vm1, %v2331_v55, 0.0 }
 0x1b5   :  { %3696 = vst [vmem:[#allocation12_spill] sm:$0xff] %v2966_v58  ;;  %3697 = vst [vmem:[#allocation13_spill] sm:$0xff] %v2970_v61  ;;  %v450_v2 = vpop.f32.mrf.mxu0  ;;  %v1513_v3 = vadd.f32 %v2966_v58, %v2970_v61 }
 0x1b6   :  { %2346 = vpow2.f32 %v1088_v0  ;;  %v2183_v4 = vadd.f32 -1.0, %v450_v2  ;;  %v1090_v6 = vmul.f32 1.442695, %v2182_v60 }
 0x1b7   :  { %v2335_v5 = vpop.eup %2334  ;;  %2348 = vpow2.f32 %v1034_v56  ;;  %v775_v8 = vpop.f32.mrf.mxu1  ;;  %1514 = vadd.xlane.f32.xlu0 %v1513_v3 }
 0x1b8   :  { %v454_v10 = vpop.f32.mrf.mxu0  ;;  %2350 = vpow2.f32 %v1036_v53  ;;  %v1092_v11 = vmul.f32 1.442695, %v2183_v4  ;;  %v2216_v13 = vadd.f32 -1.0, %v775_v8  ;;  %v2976_v19 = vsel %vm1354_vm1, %v2335_v5, 0.0  ;;  %v2978_v21 = vpop.eup %2336 }
 0x1b9   :  { %v2184_v14 = vadd.f32 -1.0, %v454_v10  ;;  %2352 = vpow2.f32 %v1086_v63  ;;  %v777_v17 = vpop.f32.mrf.mxu1  ;;  %3698 = vst [vmem:[#allocation14_spill] sm:$0xff] %v2976_v19  ;;  %3699 = vst [vmem:[#allocation15_spill] sm:$0xff] %v2978_v21  ;;  %v1516_v27 = vadd.f32 %v2978_v21, %v2976_v19 }
 0x1ba   :  { %v456_v16 = vpop.f32.mrf.mxu0  ;;  %2354 = vpow2.f32 %v1092_v11  ;;  %v1222_v22 = vmul.f32 1.442695, %v2216_v13  ;;  %v2217_v26 = vadd.f32 -1.0, %v777_v17 }
 0x1bb   :  { %v1094_v23 = vmul.f32 1.442695, %v2184_v14  ;;  %v2185_v24 = vadd.f32 -1.0, %v456_v16  ;;  %v2339_v25 = vpop.eup %2338  ;;  %2356 = vpow2.f32 %v1090_v6  ;;  %v781_v33 = vpop.f32.mrf.mxu1  ;;  %1517 = vadd.xlane.f32.xlu0 %v1516_v27 }
 0x1bc   :  { %v460_v30 = vpop.f32.mrf.mxu0  ;;  %2358 = vpow2.f32 %v1222_v22  ;;  %v2218_v36 = vadd.f32 -1.0, %v781_v33  ;;  %v1224_v37 = vmul.f32 1.442695, %v2217_v26  ;;  %v2984_v42 = vsel %vm1354_vm1, %v2339_v25, 0.0  ;;  %v2986_v44 = vpop.eup %2340 }
 0x1bd   :  { %v1096_v34 = vmul.f32 1.442695, %v2185_v24  ;;  %v2186_v35 = vadd.f32 -1.0, %v460_v30  ;;  %2360 = vpow2.f32 %v1094_v23  ;;  %v783_v40 = vpop.f32.mrf.mxu1  ;;  %3700 = vst [vmem:[#allocation16_spill] sm:$0xff] %v2984_v42  ;;  %3701 = vst [vmem:[#allocation17_spill] sm:$0xff] %v2986_v44  ;;  %v1519_v51 = vadd.f32 %v2986_v44, %v2984_v42 }
 0x1be   :  { %v462_v39 = vpop.f32.mrf.mxu0  ;;  %v1226_v47 = vmul.f32 1.442695, %v2218_v36  ;;  %v2219_v54 = vadd.f32 -1.0, %v783_v40 }
 0x1bf   :  { %2362 = vpow2.f32 %v1096_v34  ;;  %v1098_v45 = vmul.f32 1.442695, %v2186_v35  ;;  %v2187_v49 = vadd.f32 -1.0, %v462_v39  ;;  %v2343_v50 = vpop.eup %2342  ;;  %v787_v56 = vpop.f32.mrf.mxu1  ;;  %1520 = vadd.xlane.f32.xlu0 %v1519_v51 }
 0x1c0   :  { %2364 = vpow2.f32 %v1224_v37  ;;  %v466_v55 = vpop.f32.mrf.mxu0  ;;  %v2220_v0 = vadd.f32 -1.0, %v787_v56  ;;  %v1228_v60 = vmul.f32 1.442695, %v2219_v54  ;;  %v2992_v3 = vsel %vm1354_vm1, %v2343_v50, 0.0  ;;  %v2994_v4 = vpop.eup %2344 }
 0x1c1   :  { %2366 = vpow2.f32 %v1098_v45  ;;  %v1100_v57 = vmul.f32 1.442695, %v2187_v49  ;;  %v2188_v53 = vadd.f32 -1.0, %v466_v55  ;;  %v789_v2 = vpop.f32.mrf.mxu1  ;;  %3702 = vst [vmem:[#allocation18_spill] sm:$0xff] %v2992_v3  ;;  %3703 = vst [vmem:[#allocation19_spill] sm:$0xff] %v2994_v4  ;;  %v1522_v13 = vadd.f32 %v2994_v4, %v2992_v3 }
 0x1c2   :  { %2368 = vpow2.f32 %v1226_v47  ;;  %v468_v63 = vpop.f32.mrf.mxu0  ;;  %v1230_v6 = vmul.f32 1.442695, %v2220_v0  ;;  %v2221_v11 = vadd.f32 -1.0, %v789_v2 }
 0x1c3   :  { %2370 = vpow2.f32 %v1100_v57  ;;  %v1102_v5 = vmul.f32 1.442695, %v2188_v53  ;;  %v2189_v8 = vadd.f32 -1.0, %v468_v63  ;;  %v2347_v10 = vpop.eup %2346  ;;  %v793_v16 = vpop.f32.mrf.mxu1  ;;  %1523 = vadd.xlane.f32.xlu0 %v1522_v13 }
 0x1c4   :  { %2372 = vpow2.f32 %v1228_v60  ;;  %v472_v14 = vpop.f32.mrf.mxu0  ;;  %v2998_v17 = vpop.eup %2348  ;;  %v2222_v24 = vadd.f32 -1.0, %v793_v16  ;;  %v1232_v26 = vmul.f32 1.442695, %v2221_v11  ;;  %v3002_v33 = vsel %vm1354_vm1, %v2347_v10, 0.0 }
 0x1c5   :  { %2374 = vpow2.f32 %v1102_v5  ;;  %v1104_v22 = vmul.f32 1.442695, %v2189_v8  ;;  %v2190_v23 = vadd.f32 -1.0, %v472_v14  ;;  %v2351_v25 = vpop.eup %2350  ;;  %v795_v30 = vpop.f32.mrf.mxu1  ;;  %3704 = vst [vmem:[#allocation20_spill] sm:$0xff] %v3002_v33 }
 0x1c6   :  { %2376 = vpow2.f32 %v1230_v6  ;;  %v474_v27 = vpop.f32.mrf.mxu0  ;;  %v3004_v34 = vpop.eup %2352  ;;  %v1234_v36 = vmul.f32 1.442695, %v2222_v24  ;;  %v2223_v40 = vadd.f32 -1.0, %v795_v30  ;;  %v3022_v16 = vsel %vm1354_vm1, %v2351_v25, 0.0 }
 0x1c7   :  { %3705 = vst [vmem:[#allocation21_spill] sm:$0xff] %v3004_v34  ;;  %2378 = vpow2.f32 %v1104_v22  ;;  %v1106_v35 = vmul.f32 1.442695, %v2190_v23  ;;  %v2191_v37 = vadd.f32 -1.0, %v474_v27  ;;  %v2355_v39 = vpop.eup %2354  ;;  %v1525_v45 = vadd.f32 %v3004_v34, %v3002_v33  ;;  %v799_v49 = vpop.f32.mrf.mxu1 }
 0x1c8   :  { %2380 = vpow2.f32 %v1232_v26  ;;  %v478_v47 = vpop.f32.mrf.mxu0  ;;  %v3008_v50 = vpop.eup %2356  ;;  %v2224_v55 = vadd.f32 -1.0, %v799_v49  ;;  %v1236_v57 = vmul.f32 1.442695, %v2223_v40  ;;  %v3014_v60 = vsel %vm1354_vm1, %v2355_v39, 0.0 }
 0x1c9   :  { %3706 = vst [vmem:[#allocation22_spill] sm:$0xff] %v3008_v50  ;;  %2382 = vpow2.f32 %v1106_v35  ;;  %v1108_v54 = vmul.f32 1.442695, %v2191_v37  ;;  %v2192_v51 = vadd.f32 -1.0, %v478_v47  ;;  %v3010_v56 = vpop.eup %2358  ;;  %1526 = vadd.xlane.f32.xlu0 %v1525_v45  ;;  %v801_v0 = vpop.f32.mrf.mxu1  ;;  %3707 = vst [vmem:[#allocation23_spill] sm:$0xff] %v3014_v60  ;;  %v1528_v11 = vadd.f32 %v3008_v50, %v3014_v60 }
 0x1ca   :  { %2384 = vpow2.f32 %v1234_v36  ;;  %v480_v53 = vpop.f32.mrf.mxu0  ;;  %v3016_v63 = vpop.eup %2360  ;;  %v1238_v5 = vmul.f32 1.442695, %v2224_v55  ;;  %v2225_v10 = vadd.f32 -1.0, %v801_v0 }
 0x1cb   :  { %3708 = vst [vmem:[#allocation24_spill] sm:$0xff] %v3016_v63  ;;  %2386 = vpow2.f32 %v1108_v54  ;;  %v1110_v2 = vmul.f32 1.442695, %v2192_v51  ;;  %v2193_v6 = vadd.f32 -1.0, %v480_v53  ;;  %v805_v14 = vpop.f32.mrf.mxu1 }
 0x1cc   :  { %v2363_v8 = vpop.eup %2362  ;;  %2388 = vpow2.f32 %v1236_v57  ;;  %v484_v13 = vpop.f32.mrf.mxu0  ;;  %v2226_v26 = vadd.f32 -1.0, %v805_v14  ;;  %v1240_v30 = vmul.f32 1.442695, %v2225_v10 }
 0x1cd   :  { %v2365_v22 = vpop.eup %2364  ;;  %2390 = vpow2.f32 %v1110_v2  ;;  %v1112_v23 = vmul.f32 1.442695, %v2193_v6  ;;  %v2194_v24 = vadd.f32 -1.0, %v484_v13  ;;  %1529 = vadd.xlane.f32.xlu0 %v1528_v11  ;;  %v807_v36 = vpop.f32.mrf.mxu1  ;;  %v3032_v25 = vsel %vm1354_vm1, %v2363_v8, 0.0 }
 0x1ce   :  { %v3024_v27 = vpop.eup %2366  ;;  %2392 = vpow2.f32 %v1238_v5  ;;  %v486_v35 = vpop.f32.mrf.mxu0  ;;  %v3028_v37 = vsel %vm1354_vm1, %v2365_v22, 0.0  ;;  %3710 = vst [vmem:[#allocation26_spill] sm:$0xff] %v3032_v25  ;;  %v1242_v45 = vmul.f32 1.442695, %v2226_v26  ;;  %v2227_v54 = vadd.f32 -1.0, %v807_v36 }
 0x1cf   :  { %3709 = vst [vmem:[#allocation25_spill] sm:$0xff] %v3024_v27  ;;  %v3034_v39 = vpop.eup %2368  ;;  %2394 = vpow2.f32 %v1112_v23  ;;  %v1114_v40 = vmul.f32 1.442695, %v2194_v24  ;;  %v2195_v47 = vadd.f32 -1.0, %v486_v35  ;;  %v1675_v51 = vadd.f32 %v3010_v56, %v3028_v37  ;;  %v811_v53 = vpop.f32.mrf.mxu1 }
 0x1d0   :  { %v2371_v49 = vpop.eup %2370  ;;  %2396 = vpow2.f32 %v1240_v30  ;;  %v1531_v55 = vadd.f32 %v3016_v63, %v3032_v25  ;;  %v490_v57 = vpop.f32.mrf.mxu0  ;;  %v2228_v6 = vadd.f32 -1.0, %v811_v53  ;;  %v1244_v10 = vmul.f32 1.442695, %v2227_v54 }
 0x1d1   :  { %v2373_v0 = vpop.eup %2372  ;;  %2398 = vpow2.f32 %v1114_v40  ;;  %v1116_v2 = vmul.f32 1.442695, %v2195_v47  ;;  %v2196_v5 = vadd.f32 -1.0, %v490_v57  ;;  %1676 = vadd.xlane.f32.xlu1 %v1675_v51  ;;  %v813_v13 = vpop.f32.mrf.mxu1  ;;  %v3044_v14 = vsel %vm1354_vm1, %v2371_v49, 0.0 }
 0x1d2   :  { %v3040_v8 = vpop.eup %2374  ;;  %2400 = vpow2.f32 %v1242_v45  ;;  %1532 = vadd.xlane.f32.xlu0 %v1531_v55  ;;  %v492_v11 = vpop.f32.mrf.mxu0  ;;  %3712 = vst [vmem:[#allocation28_spill] sm:$0xff] %v3044_v14  ;;  %v3048_v22 = vsel %vm1354_vm1, %v2373_v0, 0.0  ;;  %v1246_v26 = vmul.f32 1.442695, %v2228_v6  ;;  %v2229_v36 = vadd.f32 -1.0, %v813_v13 }
 0x1d3   :  { %3711 = vst [vmem:[#allocation27_spill] sm:$0xff] %v3040_v8  ;;  %v3050_v23 = vpop.eup %2376  ;;  %2402 = vpow2.f32 %v1116_v2  ;;  %v1118_v24 = vmul.f32 1.442695, %v2196_v5  ;;  %v2197_v30 = vadd.f32 -1.0, %v492_v11  ;;  %v1486_v40 = vadd.f32 %v2998_v17, %v3022_v16  ;;  %v817_v49 = vpop.f32.mrf.mxu1 }
 0x1d4   :  { %v2379_v35 = vpop.eup %2378  ;;  %2404 = vpow2.f32 %v1244_v10  ;;  %v1534_v45 = vadd.f32 %v3024_v27, %v3044_v14  ;;  %v496_v47 = vpop.f32.mrf.mxu0  ;;  %v2230_v57 = vadd.f32 -1.0, %v817_v49  ;;  %v1248_v0 = vmul.f32 1.442695, %v2229_v36 }
 0x1d5   :  { %v2381_v54 = vpop.eup %2380  ;;  %2406 = vpow2.f32 %v1118_v24  ;;  %v1120_v51 = vmul.f32 1.442695, %v2197_v30  ;;  %v2198_v55 = vadd.f32 -1.0, %v496_v47  ;;  %1487 = vadd.xlane.f32.xlu1 %v1486_v40  ;;  %v819_v5 = vpop.f32.mrf.mxu1  ;;  %v1678_v6 = vadd.f32 %v3034_v39, %v3048_v22 }
 0x1d6   :  { %v3056_v53 = vpop.eup %2382  ;;  %2408 = vpow2.f32 %v1246_v26  ;;  %1535 = vadd.xlane.f32.xlu0 %v1534_v45  ;;  %v498_v2 = vpop.f32.mrf.mxu0  ;;  %v3062_v10 = vsel %vm1354_vm1, %v2379_v35, 0.0  ;;  %v1250_v24 = vmul.f32 1.442695, %v2230_v57  ;;  %v2231_v26 = vadd.f32 -1.0, %v819_v5 }
 0x1d7   :  { %3713 = vst [vmem:[#allocation29_spill] sm:$0xff] %v3056_v53  ;;  %3714 = vst [vmem:[#allocation30_spill] sm:$0xff] %v3062_v10  ;;  %v3064_v11 = vpop.eup %2384  ;;  %2410 = vpow2.f32 %v1120_v51  ;;  %v1122_v13 = vmul.f32 1.442695, %v2198_v55  ;;  %v2199_v30 = vadd.f32 -1.0, %v498_v2  ;;  %v1537_v36 = vadd.f32 %v3040_v8, %v3062_v10  ;;  %v823_v45 = vpop.f32.mrf.mxu1 }
 0x1d8   :  { %v2387_v47 = vpop.eup %2386  ;;  %2412 = vpow2.f32 %v1248_v0  ;;  %v502_v40 = vpop.f32.mrf.mxu0  ;;  %v3070_v49 = vsel %vm1354_vm1, %v2381_v54, 0.0  ;;  %v2232_v51 = vadd.f32 -1.0, %v823_v45  ;;  %v1252_v57 = vmul.f32 1.442695, %v2231_v26 }
 0x1d9   :  { %v2389_v35 = vpop.eup %2388  ;;  %2414 = vpow2.f32 %v1122_v13  ;;  %v1124_v14 = vmul.f32 1.442695, %v2199_v30  ;;  %v2200_v27 = vadd.f32 -1.0, %v502_v40  ;;  %1679 = vadd.xlane.f32.xlu1 %v1678_v6  ;;  %v825_v2 = vpop.f32.mrf.mxu1  ;;  %v3076_v5 = vsel %vm1354_vm1, %v2387_v47, 0.0 }
 0x1da   :  { %v3072_v55 = vpop.eup %2390  ;;  %2416 = vpow2.f32 %v1250_v24  ;;  %1538 = vadd.xlane.f32.xlu0 %v1537_v36  ;;  %v504_v0 = vpop.f32.mrf.mxu0  ;;  %3716 = vst [vmem:[#allocation32_spill] sm:$0xff] %v3076_v5  ;;  %v3080_v54 = vsel %vm1354_vm1, %v2389_v35, 0.0  ;;  %v1254_v40 = vmul.f32 1.442695, %v2232_v51  ;;  %v2233_v6 = vadd.f32 -1.0, %v825_v2 }
 0x1db   :  { %3715 = vst [vmem:[#allocation31_spill] sm:$0xff] %v3072_v55  ;;  %v3082_v13 = vpop.eup %2392  ;;  %2418 = vpow2.f32 %v1124_v14  ;;  %v1126_v30 = vmul.f32 1.442695, %v2200_v27  ;;  %v2201_v45 = vadd.f32 -1.0, %v504_v0  ;;  %v1681_v26 = vadd.f32 %v3050_v23, %v3070_v49  ;;  %v829_v10 = vpop.f32.mrf.mxu1 }
 0x1dc   :  { %v2395_v24 = vpop.eup %2394  ;;  %2420 = vpow2.f32 %v1252_v57  ;;  %v1540_v47 = vadd.f32 %v3056_v53, %v3076_v5  ;;  %v508_v36 = vpop.f32.mrf.mxu0  ;;  %v2234_v63 = vadd.f32 -1.0, %v829_v10  ;;  %v1256_v27 = vmul.f32 1.442695, %v2233_v6 }
 0x1dd   :  { %v2397_v8 = vpop.eup %2396  ;;  %2422 = vpow2.f32 %v1126_v30  ;;  %v1128_v35 = vmul.f32 1.442695, %v2201_v45  ;;  %v2202_v25 = vadd.f32 -1.0, %v508_v36  ;;  %1682 = vadd.xlane.f32.xlu1 %v1681_v26  ;;  %v831_v57 = vpop.f32.mrf.mxu1  ;;  %v1684_v0 = vadd.f32 %v3064_v11, %v3080_v54 }
 0x1de   :  { %v3088_v14 = vpop.eup %2398  ;;  %2424 = vpow2.f32 %v1254_v40  ;;  %1541 = vadd.xlane.f32.xlu0 %v1540_v47  ;;  %v510_v51 = vpop.f32.mrf.mxu0  ;;  %v3094_v2 = vsel %vm1354_vm1, %v2395_v24, 0.0  ;;  %v1258_v10 = vmul.f32 1.442695, %v2234_v63  ;;  %v2235_v40 = vadd.f32 -1.0, %v831_v57 }
 0x1df   :  { %3717 = vst [vmem:[#allocation33_spill] sm:$0xff] %v3088_v14  ;;  %3718 = vst [vmem:[#allocation34_spill] sm:$0xff] %v3094_v2  ;;  %v3096_v5 = vpop.eup %2400  ;;  %2426 = vpow2.f32 %v1128_v35  ;;  %v1130_v30 = vmul.f32 1.442695, %v2202_v25  ;;  %v2203_v45 = vadd.f32 -1.0, %v510_v51  ;;  %v1543_v6 = vadd.f32 %v3072_v55, %v3094_v2  ;;  %v835_v47 = vpop.f32.mrf.mxu1 }
 0x1e0   :  { %v2403_v36 = vpop.eup %2402  ;;  %2428 = vpow2.f32 %v1256_v27  ;;  %v514_v26 = vpop.f32.mrf.mxu0  ;;  %v3102_v53 = vsel %vm1354_vm1, %v2397_v8, 0.0  ;;  %v2236_v35 = vadd.f32 -1.0, %v835_v47  ;;  %v1260_v63 = vmul.f32 1.442695, %v2235_v40 }
 0x1e1   :  { %v2405_v24 = vpop.eup %2404  ;;  %2430 = vpow2.f32 %v1130_v30  ;;  %v1132_v60 = vmul.f32 1.442695, %v2203_v45  ;;  %v2204_v50 = vadd.f32 -1.0, %v514_v26  ;;  %1685 = vadd.xlane.f32.xlu1 %v1684_v0  ;;  %v837_v51 = vpop.f32.mrf.mxu1  ;;  %v3108_v57 = vsel %vm1354_vm1, %v2403_v36, 0.0 }
 0x1e2   :  { %v3104_v25 = vpop.eup %2406  ;;  %2432 = vpow2.f32 %v1258_v10  ;;  %1544 = vadd.xlane.f32.xlu0 %v1543_v6  ;;  %v516_v27 = vpop.f32.mrf.mxu0  ;;  %3720 = vst [vmem:[#allocation36_spill] sm:$0xff] %v3108_v57  ;;  %v3112_v8 = vsel %vm1354_vm1, %v2405_v24, 0.0  ;;  %v1262_v26 = vmul.f32 1.442695, %v2236_v35  ;;  %v2237_v0 = vadd.f32 -1.0, %v837_v51 }
 0x1e3   :  { %3719 = vst [vmem:[#allocation35_spill] sm:$0xff] %v3104_v25  ;;  %v3114_v30 = vpop.eup %2408  ;;  %2434 = vpow2.f32 %v1132_v60  ;;  %v1134_v45 = vmul.f32 1.442695, %v2204_v50  ;;  %v2205_v47 = vadd.f32 -1.0, %v516_v27  ;;  %v1687_v40 = vadd.f32 %v3082_v13, %v3102_v53  ;;  %v841_v2 = vpop.f32.mrf.mxu1 }
 0x1e4   :  { %v2411_v10 = vpop.eup %2410  ;;  %2436 = vpow2.f32 %v1260_v63  ;;  %v1546_v36 = vadd.f32 %v3088_v14, %v3108_v57  ;;  %v520_v6 = vpop.f32.mrf.mxu0  ;;  %v2238_v34 = vadd.f32 -1.0, %v841_v2  ;;  %v1264_v50 = vmul.f32 1.442695, %v2237_v0 }
 0x1e5   :  { %v2413_v55 = vpop.eup %2412  ;;  %2438 = vpow2.f32 %v1134_v45  ;;  %v1136_v24 = vmul.f32 1.442695, %v2205_v47  ;;  %v2206_v33 = vadd.f32 -1.0, %v520_v6  ;;  %1688 = vadd.xlane.f32.xlu1 %v1687_v40  ;;  %v843_v63 = vpop.f32.mrf.mxu1  ;;  %v1690_v27 = vadd.f32 %v3096_v5, %v3112_v8 }
 0x1e6   :  { %v3120_v60 = vpop.eup %2414  ;;  %2440 = vpow2.f32 %v1262_v26  ;;  %1547 = vadd.xlane.f32.xlu0 %v1546_v36  ;;  %v522_v35 = vpop.f32.mrf.mxu0  ;;  %v3126_v51 = vsel %vm1354_vm1, %v2411_v10, 0.0  ;;  %v1266_v2 = vmul.f32 1.442695, %v2238_v34  ;;  %v2239_v26 = vadd.f32 -1.0, %v843_v63 }
 0x1e7   :  { %3721 = vst [vmem:[#allocation37_spill] sm:$0xff] %v3120_v60  ;;  %3722 = vst [vmem:[#allocation38_spill] sm:$0xff] %v3126_v51  ;;  %v3128_v57 = vpop.eup %2416  ;;  %2442 = vpow2.f32 %v1136_v24  ;;  %v1138_v45 = vmul.f32 1.442695, %v2206_v33  ;;  %v2207_v47 = vadd.f32 -1.0, %v522_v35  ;;  %v1549_v0 = vadd.f32 %v3104_v25, %v3126_v51  ;;  %v847_v36 = vpop.f32.mrf.mxu1 }
 0x1e8   :  { %v2419_v6 = vpop.eup %2418  ;;  %2444 = vpow2.f32 %v1264_v50  ;;  %v526_v40 = vpop.f32.mrf.mxu0  ;;  %v3134_v14 = vsel %vm1354_vm1, %v2413_v55, 0.0  ;;  %v2240_v24 = vadd.f32 -1.0, %v847_v36  ;;  %v1268_v34 = vmul.f32 1.442695, %v2239_v26 }
 0x1e9   :  { %v2421_v10 = vpop.eup %2420  ;;  %2446 = vpow2.f32 %v1138_v45  ;;  %v1140_v3 = vmul.f32 1.442695, %v2207_v47  ;;  %v2208_v4 = vadd.f32 -1.0, %v526_v40  ;;  %1691 = vadd.xlane.f32.xlu1 %v1690_v27  ;;  %v849_v35 = vpop.f32.mrf.mxu1  ;;  %v3140_v63 = vsel %vm1354_vm1, %v2419_v6, 0.0 }
 0x1ea   :  { %v3136_v33 = vpop.eup %2422  ;;  %2448 = vpow2.f32 %v1266_v2  ;;  %1550 = vadd.xlane.f32.xlu0 %v1549_v0  ;;  %v528_v50 = vpop.f32.mrf.mxu0  ;;  %3724 = vst [vmem:[#allocation40_spill] sm:$0xff] %v3140_v63  ;;  %v1693_v47 = vadd.f32 %v3114_v30, %v3134_v14  ;;  %v1270_v36 = vmul.f32 1.442695, %v2240_v24  ;;  %v2241_v2 = vadd.f32 -1.0, %v849_v35 }
 0x1eb   :  { %3723 = vst [vmem:[#allocation39_spill] sm:$0xff] %v3136_v33  ;;  %v3142_v51 = vpop.eup %2424  ;;  %2450 = vpow2.f32 %v1140_v3  ;;  %v1142_v55 = vmul.f32 1.442695, %v2208_v4  ;;  %v2209_v45 = vadd.f32 -1.0, %v528_v50  ;;  %v1552_v27 = vadd.f32 %v3120_v60, %v3140_v63  ;;  %v853_v0 = vpop.f32.mrf.mxu1 }
 0x1ec   :  { %v2427_v40 = vpop.eup %2426  ;;  %v532_v26 = vpop.f32.mrf.mxu0  ;;  %v3150_v6 = vsel %vm1354_vm1, %v2421_v10, 0.0  ;;  %2452 = vpow2.f32 %v1268_v34  ;;  %v2242_v50 = vadd.f32 -1.0, %v853_v0  ;;  %v1272_v44 = vmul.f32 1.442695, %v2241_v2 }
 0x1ed   :  { %v2429_v25 = vpop.eup %2428  ;;  %v1144_v3 = vmul.f32 1.442695, %v2209_v45  ;;  %v2210_v4 = vadd.f32 -1.0, %v532_v26  ;;  %2454 = vpow2.f32 %v1142_v55  ;;  %1694 = vadd.xlane.f32.xlu1 %v1693_v47  ;;  %v855_v35 = vpop.f32.mrf.mxu1  ;;  %v3156_v63 = vsel %vm1354_vm1, %v2427_v40, 0.0 }
 0x1ee   :  { %v3152_v42 = vpop.eup %2430  ;;  %1553 = vadd.xlane.f32.xlu0 %v1552_v27  ;;  %v534_v24 = vpop.f32.mrf.mxu0  ;;  %3726 = vst [vmem:[#allocation42_spill] sm:$0xff] %v3156_v63  ;;  %v1696_v45 = vadd.f32 %v3128_v57, %v3150_v6  ;;  %v1274_v55 = vmul.f32 1.442695, %v2242_v50  ;;  %v2243_v2 = vadd.f32 -1.0, %v855_v35  ;;  %v1555_v47 = vadd.f32 %v3136_v33, %v3156_v63 }
 0x1ef   :  { %3725 = vst [vmem:[#allocation41_spill] sm:$0xff] %v3152_v42  ;;  %v3158_v60 = vpop.eup %2432  ;;  %2456 = vpow2.f32 %v1144_v3  ;;  %v1146_v10 = vmul.f32 1.442695, %v2210_v4  ;;  %v2211_v34 = vadd.f32 -1.0, %v534_v24  ;;  %v859_v0 = vpop.f32.mrf.mxu1  ;;  %v3166_v3 = vsel %vm1354_vm1, %v2429_v25, 0.0 }
 0x1f0   :  { %v2435_v26 = vpop.eup %2434  ;;  %2458 = vpow2.f32 %v1270_v36  ;;  %v538_v27 = vpop.f32.mrf.mxu0  ;;  %v1276_v24 = vmul.f32 1.442695, %v2243_v2 }
 0x1f1   :  { %v2437_v19 = vpop.eup %2436  ;;  %2460 = vpow2.f32 %v1272_v44  ;;  %v1148_v40 = vmul.f32 1.442695, %v2211_v34  ;;  %v2212_v21 = vadd.f32 -1.0, %v538_v27  ;;  %1697 = vadd.xlane.f32.xlu1 %v1696_v45  ;;  %v861_v50 = vpop.f32.mrf.mxu1  ;;  %v3172_v35 = vsel %vm1354_vm1, %v2435_v26, 0.0 }
 0x1f2   :  { %v3168_v4 = vpop.eup %2438  ;;  %2462 = vpow2.f32 %v1146_v10  ;;  %1556 = vadd.xlane.f32.xlu0 %v1555_v47  ;;  %v540_v36 = vpop.f32.mrf.mxu0  ;;  %3728 = vst [vmem:[#allocation44_spill] sm:$0xff] %v3172_v35  ;;  %v2244_v34 = vadd.f32 -1.0, %v859_v0  ;;  %v2245_v33 = vadd.f32 -1.0, %v861_v50  ;;  %v1699_v10 = vadd.f32 %v3142_v51, %v3166_v3 }
 0x1f3   :  { %3727 = vst [vmem:[#allocation43_spill] sm:$0xff] %v3168_v4  ;;  %v3174_v63 = vpop.eup %2440  ;;  %2464 = vpow2.f32 %v1148_v40  ;;  %v1150_v44 = vmul.f32 1.442695, %v2212_v21  ;;  %v2213_v27 = vadd.f32 -1.0, %v540_v36  ;;  %v1558_v45 = vadd.f32 %v3152_v42, %v3172_v35  ;;  %v865_v47 = vpop.f32.mrf.mxu1 }
 0x1f4   :  { %v2443_v25 = vpop.eup %2442  ;;  %2466 = vpow2.f32 %v1274_v55  ;;  %v544_v2 = vpop.f32.mrf.mxu0  ;;  %v3182_v21 = vsel %vm1354_vm1, %v2437_v19, 0.0  ;;  %v1280_v55 = vmul.f32 1.442695, %v2245_v33  ;;  %v2246_v42 = vadd.f32 -1.0, %v865_v47 }
 0x1f5   :  { %v2445_v61 = vpop.eup %2444  ;;  %2468 = vpow2.f32 %v1276_v24  ;;  %v1152_v26 = vmul.f32 1.442695, %v2213_v27  ;;  %v2214_v58 = vadd.f32 -1.0, %v544_v2  ;;  %1700 = vadd.xlane.f32.xlu1 %v1699_v10  ;;  %v867_v36 = vpop.f32.mrf.mxu1  ;;  %v3188_v50 = vsel %vm1354_vm1, %v2443_v25, 0.0 }
 0x1f6   :  { %v3184_v0 = vpop.eup %2446  ;;  %2470 = vpow2.f32 %v1150_v44  ;;  %1559 = vadd.xlane.f32.xlu0 %v1558_v45  ;;  %v546_v40 = vpop.f32.mrf.mxu0  ;;  %3730 = vst [vmem:[#allocation46_spill] sm:$0xff] %v3188_v50  ;;  %v1278_v24 = vmul.f32 1.442695, %v2244_v34  ;;  %v2247_v46 = vadd.f32 -1.0, %v867_v36  ;;  %v1702_v33 = vadd.f32 %v3158_v60, %v3182_v21 }
 0x1f7   :  { %3729 = vst [vmem:[#allocation45_spill] sm:$0xff] %v3184_v0  ;;  %v3190_v35 = vpop.eup %2448  ;;  %2472 = vpow2.f32 %v1152_v26  ;;  %v1154_v27 = vmul.f32 1.442695, %v2214_v58  ;;  %v2215_v2 = vadd.f32 -1.0, %v546_v40  ;;  %v1561_v44 = vadd.f32 %v3168_v4, %v3188_v50  ;;  %v871_v10 = vpop.f32.mrf.mxu1 }
 0x1f8   :  { %3731 = vst [vmem:[#allocation47_spill] sm:$0xff] %v3190_v35  ;;  %v2451_v19 = vpop.eup %2450  ;;  %2474 = vpow2.f32 %v1280_v55  ;;  %v3198_v25 = vsel %vm1354_vm1, %v2445_v61, 0.0  ;;  %v1284_v47 = vmul.f32 1.442695, %v2247_v46  ;;  %v1282_v61 = vmul.f32 1.442695, %v2246_v42 }
 0x1f9   :  { %v1156_v45 = vmul.f32 1.442695, %v2215_v2  ;;  %v3202_v58 = vsel %vm1354_vm1, %v2451_v19, 0.0  ;;  %v2453_v34 = vpop.eup %2452  ;;  %2476 = vpow2.f32 %v1154_v27  ;;  %1703 = vadd.xlane.f32.xlu1 %v1702_v33  ;;  %v873_v26 = vpop.f32.mrf.mxu1  ;;  %v2248_v50 = vadd.f32 -1.0, %v871_v10 }
 0x1fa   :  { %3732 = vst [vmem:[#allocation48_spill] sm:$0xff] %v3202_v58  ;;  %1562 = vadd.xlane.f32.xlu0 %v1561_v44  ;;  %v1564_v40 = vadd.f32 %v3184_v0, %v3202_v58  ;;  %v3206_v36 = vpop.eup %2454  ;;  %v2249_v55 = vadd.f32 -1.0, %v873_v26  ;;  %v1705_v19 = vadd.f32 %v3174_v63, %v3198_v25  ;;  %v3214_v33 = vsel %vm1354_vm1, %v2453_v34, 0.0 }
 0x1fb   :  { %3733 = vst [vmem:[#allocation49_spill] sm:$0xff] %v3206_v36  ;;  %2478 = vpow2.f32 %v1156_v45  ;;  %v877_v4 = vpop.f32.mrf.mxu1  ;;  %3735 = vst [vmem:[#allocation51_spill] sm:$0xff] %v3214_v33  ;;  %v1708_v34 = vadd.f32 %v3190_v35, %v3214_v33 }
 0x1fc   :  { %v2457_v2 = vpop.eup %2456  ;;  %2480 = vpow2.f32 %v1278_v24  ;;  %v1288_v46 = vmul.f32 1.442695, %v2249_v55  ;;  %v1286_v55 = vmul.f32 1.442695, %v2248_v50  ;;  %v2250_v58 = vadd.f32 -1.0, %v877_v4 }
 0x1fd   :  { %v3210_v27 = vpop.eup %2458  ;;  %2482 = vpow2.f32 %v1284_v47  ;;  %v3218_v44 = vsel %vm1354_vm1, %v2457_v2, 0.0  ;;  %1706 = vadd.xlane.f32.xlu1 %v1705_v19  ;;  %v879_v42 = vpop.f32.mrf.mxu1 }
 0x1fe   :  { %3734 = vst [vmem:[#allocation50_spill] sm:$0xff] %v3210_v27  ;;  %3736 = vst [vmem:[#allocation52_spill] sm:$0xff] %v3218_v44  ;;  %v2461_v45 = vpop.eup %2460  ;;  %1565 = vadd.xlane.f32.xlu0 %v1564_v40  ;;  %v1567_v24 = vadd.f32 %v3206_v36, %v3218_v44  ;;  %v2251_v26 = vadd.f32 -1.0, %v879_v42  ;;  %2484 = vpow2.f32 %v1282_v61 }
 0x1ff   :  { %v3222_v10 = vpop.eup %2462  ;;  %v883_v0 = vpop.f32.mrf.mxu1  ;;  %2486 = vpow2.f32 %v1288_v46  ;;  %v3230_v40 = vsel %vm1354_vm1, %v2461_v45, 0.0 }
 0x200   :  { %3737 = vst [vmem:[#allocation53_spill] sm:$0xff] %v3222_v10  ;;  %v2465_v47 = vpop.eup %2464  ;;  %v1292_v19 = vmul.f32 1.442695, %v2251_v26  ;;  %3739 = vst [vmem:[#allocation55_spill] sm:$0xff] %v3230_v40  ;;  %2488 = vpow2.f32 %v1286_v55  ;;  %v1290_v26 = vmul.f32 1.442695, %v2250_v58  ;;  %v1711_v45 = vadd.f32 %v3210_v27, %v3230_v40 }
 0x201   :  { %v3226_v2 = vpop.eup %2466  ;;  %v3234_v44 = vsel %vm1354_vm1, %v2465_v47, 0.0  ;;  %1709 = vadd.xlane.f32.xlu1 %v1708_v34  ;;  %v885_v4 = vpop.f32.mrf.mxu1  ;;  %v2252_v33 = vadd.f32 -1.0, %v883_v0 }
 0x202   :  { %3738 = vst [vmem:[#allocation54_spill] sm:$0xff] %v3226_v2  ;;  %3740 = vst [vmem:[#allocation56_spill] sm:$0xff] %v3234_v44  ;;  %v2469_v42 = vpop.eup %2468  ;;  %1568 = vadd.xlane.f32.xlu0 %v1567_v24  ;;  %v1570_v50 = vadd.f32 %v3222_v10, %v3234_v44  ;;  %v2253_v36 = vadd.f32 -1.0, %v885_v4  ;;  %2490 = vpow2.f32 %v1292_v19 }
 0x203   :  { %v3238_v61 = vpop.eup %2470  ;;  %v889_v35 = vpop.f32.mrf.mxu1  ;;  %v3244_v24 = vsel %vm1354_vm1, %v2469_v42, 0.0  ;;  %2492 = vpow2.f32 %v1290_v26 }
 0x204   :  { %3741 = vst [vmem:[#allocation57_spill] sm:$0xff] %v3238_v61  ;;  %v2473_v46 = vpop.eup %2472  ;;  %v1296_v47 = vmul.f32 1.442695, %v2253_v36  ;;  %3742 = vst [vmem:[#allocation58_spill] sm:$0xff] %v3244_v24  ;;  %v1294_v36 = vmul.f32 1.442695, %v2252_v33  ;;  %v1714_v42 = vadd.f32 %v3226_v2, %v3244_v24 }
 0x205   :  { %v3248_v34 = vsel %vm1354_vm1, %v2473_v46, 0.0  ;;  %v2475_v44 = vpop.eup %2474  ;;  %1712 = vadd.xlane.f32.xlu1 %v1711_v45  ;;  %v891_v55 = vpop.f32.mrf.mxu1  ;;  %v2254_v10 = vadd.f32 -1.0, %v889_v35 }
 0x206   :  { %3743 = vst [vmem:[#allocation59_spill] sm:$0xff] %v3248_v34  ;;  %1571 = vadd.xlane.f32.xlu0 %v1570_v50  ;;  %v1573_v0 = vadd.f32 %v3238_v61, %v3248_v34  ;;  %v3252_v58 = vpop.eup %2476  ;;  %v2255_v4 = vadd.f32 -1.0, %v891_v55  ;;  %2494 = vpow2.f32 %v1296_v47  ;;  %v3260_v50 = vsel %vm1354_vm1, %v2475_v44, 0.0 }
 0x207   :  { %3744 = vst [vmem:[#allocation60_spill] sm:$0xff] %v3252_v58  ;;  %v895_v40 = vpop.f32.mrf.mxu1  ;;  %3746 = vst [vmem:[#allocation62_spill] sm:$0xff] %v3260_v50  ;;  %2496 = vpow2.f32 %v1294_v36  ;;  %v1298_v61 = vmul.f32 1.442695, %v2254_v10 }
 0x208   :  { %v2479_v19 = vpop.eup %2478  ;;  %v1300_v45 = vmul.f32 1.442695, %v2255_v4  ;;  %v2256_v47 = vadd.f32 -1.0, %v895_v40 }
 0x209   :  { %v3256_v46 = vpop.eup %2480  ;;  %v3264_v34 = vsel %vm1354_vm1, %v2479_v19, 0.0  ;;  %1715 = vadd.xlane.f32.xlu1 %v1714_v42  ;;  %v897_v35 = vpop.f32.mrf.mxu1 }
 0x20a   :  { %3745 = vst [vmem:[#allocation61_spill] sm:$0xff] %v3256_v46  ;;  %3747 = vst [vmem:[#allocation63_spill] sm:$0xff] %v3264_v34  ;;  %v2483_v55 = vpop.eup %2482  ;;  %1574 = vadd.xlane.f32.xlu0 %v1573_v0  ;;  %v1576_v33 = vadd.f32 %v3252_v58, %v3264_v34  ;;  %v2257_v26 = vadd.f32 -1.0, %v897_v35  ;;  %v1717_v4 = vadd.f32 %v3256_v46, %v3260_v50  ;;  %2498 = vpow2.f32 %v1300_v45 }
 0x20b   :  { %v901_v44 = vpop.f32.mrf.mxu1  ;;  %v3270_v24 = vpop.eup %2484  ;;  %v3274_v42 = vsel %vm1354_vm1, %v2483_v55, 0.0  ;;  %2500 = vpow2.f32 %v1298_v61  ;;  %v1302_v10 = vmul.f32 1.442695, %v2256_v47 }
 0x20c   :  { %3748 = vst [vmem:[#allocation64_spill] sm:$0xff] %v3270_v24  ;;  %v1304_v19 = vmul.f32 1.442695, %v2257_v26  ;;  %3749 = vst [vmem:[#allocation65_spill] sm:$0xff] %v3274_v42  ;;  %v2487_v0 = vpop.eup %2486  ;;  %v2258_v40 = vadd.f32 -1.0, %v901_v44  ;;  %v1720_v36 = vadd.f32 %v3270_v24, %v3274_v42 }
 0x20d   :  { %1718 = vadd.xlane.f32.xlu1 %v1717_v4  ;;  %v903_v34 = vpop.f32.mrf.mxu1  ;;  %v3278_v50 = vpop.eup %2488  ;;  %v3282_v55 = vsel %vm1354_vm1, %v2487_v0, 0.0 }
 0x20e   :  { %1577 = vadd.xlane.f32.xlu0 %v1576_v33  ;;  %v2259_v35 = vadd.f32 -1.0, %v903_v34  ;;  %3750 = vst [vmem:[#allocation66_spill] sm:$0xff] %v3278_v50  ;;  %2502 = vpow2.f32 %v1304_v19  ;;  %3751 = vst [vmem:[#allocation67_spill] sm:$0xff] %v3282_v55  ;;  %v1306_v61 = vmul.f32 1.442695, %v2258_v40  ;;  %v1723_v47 = vadd.f32 %v3278_v50, %v3282_v55 }
 0x20f   :  { %v907_v58 = vpop.f32.mrf.mxu1  ;;  %v2491_v26 = vpop.eup %2490  ;;  %2504 = vpow2.f32 %v1302_v10 }
 0x210   :  { %v1308_v45 = vmul.f32 1.442695, %v2259_v35  ;;  %v2260_v34 = vadd.f32 -1.0, %v907_v58  ;;  %v3286_v42 = vpop.eup %2492  ;;  %v3290_v35 = vsel %vm1354_vm1, %v2491_v26, 0.0 }
 0x211   :  { %1721 = vadd.xlane.f32.xlu1 %v1720_v36  ;;  %v909_v33 = vpop.f32.mrf.mxu1  ;;  %3752 = vst [vmem:[#allocation68_spill] sm:$0xff] %v3286_v42  ;;  %3753 = vst [vmem:[#allocation69_spill] sm:$0xff] %v3290_v35  ;;  %v1726_v58 = vadd.f32 %v3286_v42, %v3290_v35 }
 0x212   :  { %v2261_v4 = vadd.f32 -1.0, %v909_v33  ;;  %2506 = vpow2.f32 %v1308_v45  ;;  %v1310_v10 = vmul.f32 1.442695, %v2260_v34 }
 0x213   :  { %v913_v44 = vpop.f32.mrf.mxu1  ;;  %v2495_v0 = vpop.eup %2494  ;;  %2508 = vpow2.f32 %v1306_v61 }
 0x214   :  { %v1312_v19 = vmul.f32 1.442695, %v2261_v4  ;;  %v2262_v40 = vadd.f32 -1.0, %v913_v44  ;;  %v3294_v55 = vpop.eup %2496  ;;  %v3298_v4 = vsel %vm1354_vm1, %v2495_v0, 0.0 }
 0x215   :  { %1724 = vadd.xlane.f32.xlu1 %v1723_v47  ;;  %v915_v36 = vpop.f32.mrf.mxu1  ;;  %3754 = vst [vmem:[#allocation70_spill] sm:$0xff] %v3294_v55  ;;  %3755 = vst [vmem:[#allocation71_spill] sm:$0xff] %v3298_v4  ;;  %v1729_v44 = vadd.f32 %v3294_v55, %v3298_v4 }
 0x216   :  { %v2263_v24 = vadd.f32 -1.0, %v915_v36  ;;  %2510 = vpow2.f32 %v1312_v19  ;;  %v1314_v61 = vmul.f32 1.442695, %v2262_v40 }
 0x217   :  { %v919_v33 = vpop.f32.mrf.mxu1  ;;  %v2499_v26 = vpop.eup %2498  ;;  %2512 = vpow2.f32 %v1310_v10 }
 0x218   :  { %v1316_v45 = vmul.f32 1.442695, %v2263_v24  ;;  %v2264_v34 = vadd.f32 -1.0, %v919_v33  ;;  %v3302_v35 = vpop.eup %2500  ;;  %v3306_v24 = vsel %vm1354_vm1, %v2499_v26, 0.0 }
 0x219   :  { %1727 = vadd.xlane.f32.xlu1 %v1726_v58  ;;  %v921_v47 = vpop.f32.mrf.mxu1  ;;  %3756 = vst [vmem:[#allocation72_spill] sm:$0xff] %v3302_v35  ;;  %3757 = vst [vmem:[#allocation73_spill] sm:$0xff] %v3306_v24  ;;  %v1732_v33 = vadd.f32 %v3302_v35, %v3306_v24  ;;  %v3320_v35 = vpop.xlane.xlu0 %1484 }
 0x21a   :  { %v2265_v50 = vadd.f32 -1.0, %v921_v47  ;;  %2514 = vpow2.f32 %v1316_v45  ;;  %v1318_v10 = vmul.f32 1.442695, %v2264_v34 }
 0x21b   :  { %v925_v36 = vpop.f32.mrf.mxu1  ;;  %v2503_v0 = vpop.eup %2502  ;;  %2516 = vpow2.f32 %v1314_v61 }
 0x21c   :  { %v1320_v19 = vmul.f32 1.442695, %v2265_v50  ;;  %v2266_v40 = vadd.f32 -1.0, %v925_v36  ;;  %v3310_v4 = vpop.eup %2504  ;;  %v3314_v50 = vsel %vm1354_vm1, %v2503_v0, 0.0 }
 0x21d   :  { %1730 = vadd.xlane.f32.xlu1 %v1729_v44  ;;  %v927_v58 = vpop.f32.mrf.mxu1  ;;  %3758 = vst [vmem:[#allocation74_spill] sm:$0xff] %v3310_v4  ;;  %3759 = vst [vmem:[#allocation75_spill] sm:$0xff] %v3314_v50  ;;  %v1735_v36 = vadd.f32 %v3310_v4, %v3314_v50 }
 0x21e   :  { %v2267_v42 = vadd.f32 -1.0, %v927_v58  ;;  %2518 = vpow2.f32 %v1320_v19  ;;  %v1322_v61 = vmul.f32 1.442695, %v2266_v40 }
 0x21f   :  { %v931_v47 = vpop.f32.mrf.mxu1  ;;  %v2507_v26 = vpop.eup %2506  ;;  %2520 = vpow2.f32 %v1318_v10 }
 0x220   :  { %v1324_v45 = vmul.f32 1.442695, %v2267_v42  ;;  %v2268_v34 = vadd.f32 -1.0, %v931_v47  ;;  %v3318_v24 = vpop.eup %2508  ;;  %v3324_v19 = vsel %vm1354_vm1, %v2507_v26, 0.0  ;;  %v3330_v46 = vpop.xlane.xlu0 %1490 }
 0x221   :  { %1733 = vadd.xlane.f32.xlu1 %v1732_v33  ;;  %v933_v44 = vpop.f32.mrf.mxu1  ;;  %3760 = vst [vmem:[#allocation76_spill] sm:$0xff] %v3318_v24  ;;  %3761 = vst [vmem:[#allocation77_spill] sm:$0xff] %v3324_v19 }
 0x222   :  { %v2269_v55 = vadd.f32 -1.0, %v933_v44  ;;  %2522 = vpow2.f32 %v1324_v45  ;;  %v1326_v40 = vmul.f32 1.442695, %v2268_v34  ;;  %v1738_v44 = vadd.f32 %v3318_v24, %v3324_v19 }
 0x223   :  { %v937_v58 = vpop.f32.mrf.mxu1  ;;  %v2511_v0 = vpop.eup %2510  ;;  %2524 = vpow2.f32 %v1322_v61 }
 0x224   :  { %v1328_v42 = vmul.f32 1.442695, %v2269_v55  ;;  %v2270_v47 = vadd.f32 -1.0, %v937_v58  ;;  %v3328_v4 = vpop.eup %2512  ;;  %v3334_v45 = vsel %vm1354_vm1, %v2511_v0, 0.0  ;;  %v3344_v2 = vpop.xlane.xlu0 %1493 }
 0x225   :  { %1736 = vadd.xlane.f32.xlu1 %v1735_v36  ;;  %v939_v33 = vpop.f32.mrf.mxu1  ;;  %3762 = vst [vmem:[#allocation78_spill] sm:$0xff] %v3328_v4  ;;  %3763 = vst [vmem:[#allocation79_spill] sm:$0xff] %v3334_v45 }
 0x226   :  { %v2271_v10 = vadd.f32 -1.0, %v939_v33  ;;  %2526 = vpow2.f32 %v1328_v42  ;;  %v1330_v34 = vmul.f32 1.442695, %v2270_v47  ;;  %v1741_v33 = vadd.f32 %v3328_v4, %v3334_v45 }
 0x227   :  { %v943_v50 = vpop.f32.mrf.mxu1  ;;  %v2515_v26 = vpop.eup %2514  ;;  %2528 = vpow2.f32 %v1326_v40 }
 0x228   :  { %v1332_v55 = vmul.f32 1.442695, %v2271_v10  ;;  %v2272_v58 = vadd.f32 -1.0, %v943_v50  ;;  %v3338_v24 = vpop.eup %2516  ;;  %v3342_v10 = vsel %vm1354_vm1, %v2515_v26, 0.0 }
 0x229   :  { %1739 = vadd.xlane.f32.xlu1 %v1738_v44  ;;  %v945_v36 = vpop.f32.mrf.mxu1  ;;  %3764 = vst [vmem:[#allocation80_spill] sm:$0xff] %v3338_v24  ;;  %3765 = vst [vmem:[#allocation81_spill] sm:$0xff] %v3342_v10 }
 0x22a   :  { %v2273_v61 = vadd.f32 -1.0, %v945_v36  ;;  %2530 = vpow2.f32 %v1332_v55  ;;  %v1334_v50 = vmul.f32 1.442695, %v2272_v58  ;;  %v1744_v36 = vadd.f32 %v3338_v24, %v3342_v10  ;;  %v3358_v24 = vpop.xlane.xlu0 %1496 }
 0x22b   :  { %v949_v19 = vpop.f32.mrf.mxu1  ;;  %v2519_v0 = vpop.eup %2518  ;;  %2532 = vpow2.f32 %v1330_v34 }
 0x22c   :  { %v1336_v42 = vmul.f32 1.442695, %v2273_v61  ;;  %v2274_v47 = vadd.f32 -1.0, %v949_v19  ;;  %v3348_v4 = vpop.eup %2520  ;;  %v3352_v26 = vsel %vm1354_vm1, %v2519_v0, 0.0 }
 0x22d   :  { %1742 = vadd.xlane.f32.xlu1 %v1741_v33  ;;  %v951_v44 = vpop.f32.mrf.mxu1  ;;  %3766 = vst [vmem:[#allocation82_spill] sm:$0xff] %v3348_v4  ;;  %3767 = vst [vmem:[#allocation83_spill] sm:$0xff] %v3352_v26  ;;  %v1747_v19 = vadd.f32 %v3348_v4, %v3352_v26 }
 0x22e   :  { %v2275_v40 = vadd.f32 -1.0, %v951_v44  ;;  %2534 = vpow2.f32 %v1336_v42  ;;  %v1338_v34 = vmul.f32 1.442695, %v2274_v47 }
 0x22f   :  { %v955_v45 = vpop.f32.mrf.mxu1  ;;  %v2523_v61 = vpop.eup %2522  ;;  %2536 = vpow2.f32 %v1334_v50 }
 0x230   :  { %v1340_v55 = vmul.f32 1.442695, %v2275_v40  ;;  %v2276_v58 = vadd.f32 -1.0, %v955_v45  ;;  %v3356_v10 = vpop.eup %2524  ;;  %v3362_v0 = vsel %vm1354_vm1, %v2523_v61, 0.0  ;;  %v3372_v61 = vpop.xlane.xlu0 %1499 }
 0x231   :  { %1745 = vadd.xlane.f32.xlu1 %v1744_v36  ;;  %v957_v33 = vpop.f32.mrf.mxu1  ;;  %3768 = vst [vmem:[#allocation84_spill] sm:$0xff] %v3362_v0 }
 0x232   :  { %v2277_v27 = vadd.f32 -1.0, %v957_v33  ;;  %2538 = vpow2.f32 %v1340_v55  ;;  %v1342_v45 = vmul.f32 1.442695, %v2276_v58  ;;  %v1750_v33 = vadd.f32 %v3356_v10, %v3362_v0 }
 0x233   :  { %v961_v44 = vpop.f32.mrf.mxu1  ;;  %v2527_v40 = vpop.eup %2526  ;;  %2540 = vpow2.f32 %v1338_v34 }
 0x234   :  { %v1344_v42 = vmul.f32 1.442695, %v2277_v27  ;;  %v2278_v47 = vadd.f32 -1.0, %v961_v44  ;;  %v3366_v26 = vpop.eup %2528  ;;  %v3370_v27 = vsel %vm1354_vm1, %v2527_v40, 0.0 }
 0x235   :  { %1748 = vadd.xlane.f32.xlu1 %v1747_v19  ;;  %v963_v36 = vpop.f32.mrf.mxu1  ;;  %3769 = vst [vmem:[#allocation85_spill] sm:$0xff] %v3366_v26  ;;  %3770 = vst [vmem:[#allocation86_spill] sm:$0xff] %v3370_v27  ;;  %v1753_v34 = vadd.f32 %v3366_v26, %v3370_v27 }
 0x236   :  { %v2279_v50 = vadd.f32 -1.0, %v963_v36  ;;  %2542 = vpow2.f32 %v1344_v42  ;;  %v1346_v19 = vmul.f32 1.442695, %v2278_v47 }
 0x237   :  { %v2531_v55 = vpop.eup %2530  ;;  %2544 = vpow2.f32 %v1342_v45 }
 0x238   :  { %v1348_v4 = vmul.f32 1.442695, %v2279_v50  ;;  %v3376_v58 = vpop.eup %2532  ;;  %v3380_v44 = vsel %vm1354_vm1, %v2531_v55, 0.0  ;;  %v3386_v50 = vpop.xlane.xlu0 %1502 }
 0x239   :  { %1751 = vadd.xlane.f32.xlu1 %v1750_v33  ;;  %3771 = vst [vmem:[#allocation87_spill] sm:$0xff] %v3376_v58  ;;  %3772 = vst [vmem:[#allocation88_spill] sm:$0xff] %v3380_v44  ;;  %v1756_v40 = vadd.f32 %v3376_v58, %v3380_v44 }
 0x23a   :  { %2546 = vpow2.f32 %v1348_v4 }
 0x23b   :  { %v2535_v42 = vpop.eup %2534  ;;  %2548 = vpow2.f32 %v1346_v19 }
 0x23c   :  { %v3384_v36 = vpop.eup %2536  ;;  %v3390_v45 = vsel %vm1354_vm1, %v2535_v42, 0.0  ;;  %2550 = vrcp.f32 %v3320_v35 }
 0x23d   :  { %1754 = vadd.xlane.f32.xlu1 %v1753_v34  ;;  %3773 = vst [vmem:[#allocation89_spill] sm:$0xff] %v3384_v36  ;;  %3774 = vst [vmem:[#allocation90_spill] sm:$0xff] %v3390_v45  ;;  %v1759_v4 = vadd.f32 %v3384_v36, %v3390_v45  ;;  %v3400_v34 = vpop.xlane.xlu0 %1505 }
 0x23f   :  { %v2539_v47 = vpop.eup %2538 }
 0x240   :  { %v3394_v33 = vpop.eup %2540  ;;  %v3398_v55 = vsel %vm1354_vm1, %v2539_v47, 0.0 }
 0x241   :  { %1757 = vadd.xlane.f32.xlu1 %v1756_v40  ;;  %3775 = vst [vmem:[#allocation91_spill] sm:$0xff] %v3394_v33  ;;  %3776 = vst [vmem:[#allocation92_spill] sm:$0xff] %v3398_v55  ;;  %v1762_v44 = vadd.f32 %v3394_v33, %v3398_v55  ;;  %v3414_v58 = vpop.xlane.xlu0 %1508 }
 0x243   :  { %v2543_v19 = vpop.eup %2542 }
 0x244   :  { %v3404_v42 = vpop.eup %2544  ;;  %v3408_v40 = vsel %vm1354_vm1, %v2543_v19, 0.0 }
 0x245   :  { %1760 = vadd.xlane.f32.xlu1 %v1759_v4  ;;  %3777 = vst [vmem:[#allocation93_spill] sm:$0xff] %v3404_v42  ;;  %3778 = vst [vmem:[#allocation94_spill] sm:$0xff] %v3408_v40  ;;  %v1765_v36 = vadd.f32 %v3404_v42, %v3408_v40  ;;  %v3422_v19 = vpop.xlane.xlu0 %1511 }
 0x247   :  { %v2547_v45 = vpop.eup %2546 }
 0x248   :  { %v3412_v47 = vpop.eup %2548  ;;  %v3418_v4 = vsel %vm1354_vm1, %v2547_v45, 0.0 }
 0x249   :  { %1763 = vadd.xlane.f32.xlu1 %v1762_v44  ;;  %3779 = vst [vmem:[#allocation95_spill] sm:$0xff] %v3412_v47  ;;  %3780 = vst [vmem:[#allocation96_spill] sm:$0xff] %v3418_v4  ;;  %v1768_v55 = vadd.f32 %v3412_v47, %v3418_v4  ;;  %v3424_v33 = vpop.xlane.xlu0 %1514 }
 0x24d   :  { %1766 = vadd.xlane.f32.xlu1 %v1765_v36  ;;  %v3427_v40 = vpop.xlane.xlu0 %1517 }
 0x251   :  { %1769 = vadd.xlane.f32.xlu1 %v1768_v55  ;;  %v3430_v36 = vpop.xlane.xlu0 %1520  ;;  %v2551_v55 = vpop.eup %2550 }
 0x252   :  { %v1611_v47 = vmul.f32 %v2551_v55, %v2892_v12 }
 0x255   :  { %v3437_v27 = vpop.xlane.xlu0 %1523 }
 0x25a   :  { %v1677_v44 = vpop.xlane.xlu1 %1676 }
 0x25b   :  { %2552 = vrcp.f32 %v1677_v44 }
 0x25e   :  { %v1488_v42 = vpop.xlane.xlu1 %1487 }
 0x25f   :  { %2554 = vrcp.f32 %v1488_v42  ;;  %v1612_v42 = vmul.f32 %v2551_v55, %v2896_v15 }
 0x262   :  { %v1680_v1 = vpop.xlane.xlu1 %1679 }
 0x263   :  { %2556 = vrcp.f32 %v1680_v1 }
 0x264   :  { %2558 = vrcp.f32 %v3330_v46 }
 0x266   :  { %v1683_v45 = vpop.xlane.xlu1 %1682 }
 0x267   :  { %2560 = vrcp.f32 %v1683_v45 }
 0x268   :  { %v2553_v4 = vpop.eup %2552  ;;  %2562 = vrcp.f32 %v3344_v2 }
 0x269   :  { %v1803_v35 = vmul.f32 %v2553_v4, %v3010_v56  ;;  %v1804_v44 = vmul.f32 %v2553_v4, %v3028_v37  ;;  %v3441_v56 = vpop.xlane.xlu0 %1526 }
 0x26a   :  { %v1686_v1 = vpop.xlane.xlu1 %1685 }
 0x26b   :  { %2564 = vrcp.f32 %v1686_v1  ;;  %v1867_v46 = vsub.f32 %v1611_v47, %v1803_v35  ;;  %v1868_v26 = vsub.f32 %v1612_v42, %v1804_v44 }
 0x26c   :  { %2566 = vrcp.f32 %v3358_v24  ;;  %v2555_v45 = vpop.eup %2554 }
 0x26d   :  { %v1931_v37 = vmul.f32 %v1867_v46, %v1867_v46  ;;  %v1932_v12 = vmul.f32 %v1868_v26, %v1868_v26  ;;  %v1613_v15 = vmul.f32 %v2555_v45, %v2998_v17  ;;  %v1614_v55 = vmul.f32 %v2555_v45, %v3022_v16  ;;  %v3452_v45 = vpop.xlane.xlu0 %1529 }
 0x26e   :  { %v1689_v0 = vpop.xlane.xlu1 %1688 }
 0x26f   :  { %2568 = vrcp.f32 %v1689_v0  ;;  %v1995_v46 = vadd.f32 %v1932_v12, %v1931_v37 }
 0x270   :  { %v2557_v2 = vpop.eup %2556  ;;  %2570 = vrcp.f32 %v3372_v61 }
 0x271   :  { %v2559_v4 = vpop.eup %2558  ;;  %v1805_v1 = vmul.f32 %v2557_v2, %v3034_v39  ;;  %v1806_v24 = vmul.f32 %v2557_v2, %v3048_v22 }
 0x272   :  { %v1692_v47 = vpop.xlane.xlu1 %1691  ;;  %v1615_v61 = vmul.f32 %v2559_v4, %v2900_v28  ;;  %v1616_v42 = vmul.f32 %v2559_v4, %v2904_v31 }
 0x273   :  { %v1869_v35 = vsub.f32 %v1613_v15, %v1805_v1  ;;  %v1870_v44 = vsub.f32 %v1614_v55, %v1806_v24  ;;  %2572 = vrcp.f32 %v1692_v47 }
 0x274   :  { %v2561_v0 = vpop.eup %2560  ;;  %2574 = vrcp.f32 %v3386_v50 }
 0x275   :  { %v2563_v26 = vpop.eup %2562  ;;  %v1933_v17 = vmul.f32 %v1869_v35, %v1869_v35  ;;  %v1807_v16 = vmul.f32 %v2561_v0, %v3050_v23  ;;  %v1808_v39 = vmul.f32 %v2561_v0, %v3070_v49  ;;  %v1934_v22 = vmul.f32 %v1870_v44, %v1870_v44 }
 0x276   :  { %v1695_v2 = vpop.xlane.xlu1 %1694  ;;  %v1617_v31 = vmul.f32 %v2563_v26, %v2908_v38  ;;  %v1618_v49 = vmul.f32 %v2563_v26, %v2912_v41 }
 0x277   :  { %v1996_v15 = vadd.f32 %v1995_v46, %v1933_v17  ;;  %v1871_v55 = vsub.f32 %v1615_v61, %v1807_v16  ;;  %v1872_v1 = vsub.f32 %v1616_v42, %v1808_v39  ;;  %2576 = vrcp.f32 %v1695_v2 }
 0x278   :  { %v2565_v28 = vpop.eup %2564  ;;  %2578 = vrcp.f32 %v3400_v34  ;;  %v3462_v34 = vpop.xlane.xlu0 %1532 }
 0x279   :  { %v2567_v4 = vpop.eup %2566  ;;  %v1997_v50 = vadd.f32 %v1996_v15, %v1934_v22  ;;  %v1935_v37 = vmul.f32 %v1871_v55, %v1871_v55  ;;  %v1809_v23 = vmul.f32 %v2565_v28, %v3064_v11  ;;  %v1810_v12 = vmul.f32 %v2565_v28, %v3080_v54 }
 0x27a   :  { %v1698_v24 = vpop.xlane.xlu1 %1697  ;;  %v1936_v47 = vmul.f32 %v1872_v1, %v1872_v1  ;;  %v1619_v61 = vmul.f32 %v2567_v4, %v2916_v48  ;;  %v1620_v38 = vmul.f32 %v2567_v4, %v2920_v52 }
 0x27b   :  { %v1998_v35 = vadd.f32 %v1997_v50, %v1935_v37  ;;  %v1873_v44 = vsub.f32 %v1617_v31, %v1809_v23  ;;  %2580 = vrcp.f32 %v1698_v24  ;;  %v1874_v42 = vsub.f32 %v1618_v49, %v1810_v12 }
 0x27c   :  { %v2569_v0 = vpop.eup %2568  ;;  %2582 = vrcp.f32 %v3414_v58  ;;  %v3470_v28 = vpop.xlane.xlu0 %1535 }
 0x27d   :  { %v2571_v11 = vpop.eup %2570  ;;  %v1999_v46 = vadd.f32 %v1998_v35, %v1936_v47  ;;  %v1937_v41 = vmul.f32 %v1873_v44, %v1873_v44  ;;  %v1811_v54 = vmul.f32 %v2569_v0, %v3082_v13  ;;  %v1812_v26 = vmul.f32 %v2569_v0, %v3102_v53 }
 0x27e   :  { %v1938_v17 = vmul.f32 %v1874_v42, %v1874_v42  ;;  %v1701_v16 = vpop.xlane.xlu1 %1700  ;;  %v1621_v58 = vmul.f32 %v2571_v11, %v2924_v59  ;;  %v1622_v13 = vmul.f32 %v2571_v11, %v2928_v62 }
 0x27f   :  { %v2000_v39 = vadd.f32 %v1999_v46, %v1937_v41  ;;  %v1875_v22 = vsub.f32 %v1619_v61, %v1811_v54  ;;  %v1876_v2 = vsub.f32 %v1620_v38, %v1812_v26  ;;  %2584 = vrcp.f32 %v1701_v16 }
 0x280   :  { %v2573_v48 = vpop.eup %2572  ;;  %2586 = vrcp.f32 %v3422_v19 }
 0x281   :  { %v2575_v52 = vpop.eup %2574  ;;  %v2001_v15 = vadd.f32 %v2000_v39, %v1938_v17  ;;  %v1939_v55 = vmul.f32 %v1875_v22, %v1875_v22  ;;  %v1813_v1 = vmul.f32 %v2573_v48, %v3096_v5  ;;  %v1814_v53 = vmul.f32 %v2573_v48, %v3112_v8 }
 0x282   :  { %v1704_v31 = vpop.xlane.xlu1 %1703  ;;  %v1940_v4 = vmul.f32 %v1876_v2, %v1876_v2  ;;  %v1623_v19 = vmul.f32 %v2575_v52, %v2932_v7  ;;  %v1624_v59 = vmul.f32 %v2575_v52, %v2936_v9  ;;  %v3479_v7 = vpop.xlane.xlu0 %1538 }
 0x283   :  { %v2002_v50 = vadd.f32 %v2001_v15, %v1939_v55  ;;  %v1877_v37 = vsub.f32 %v1621_v58, %v1813_v1  ;;  %2588 = vrcp.f32 %v1704_v31  ;;  %v1878_v49 = vsub.f32 %v1622_v13, %v1814_v53  ;;  %v3781_v31 = vld [vmem:[#allocation11_spill] sm:$0xff] }
 0x284   :  { %v2577_v23 = vpop.eup %2576  ;;  %2590 = vrcp.f32 %v3424_v33 }
 0x285   :  { %v2003_v5 = vadd.f32 %v2002_v50, %v1940_v4  ;;  %v1941_v12 = vmul.f32 %v1877_v37, %v1877_v37  ;;  %v1815_v62 = vmul.f32 %v2577_v23, %v3114_v30  ;;  %v1816_v24 = vmul.f32 %v2577_v23, %v3134_v14  ;;  %v2579_v8 = vpop.eup %2578 }
 0x286   :  { %v1942_v47 = vmul.f32 %v1878_v49, %v1878_v49  ;;  %v1707_v35 = vpop.xlane.xlu1 %1706  ;;  %v1625_v33 = vmul.f32 %v2579_v8, %v2940_v18  ;;  %v1626_v14 = vmul.f32 %v2579_v8, %v2944_v20  ;;  %v3490_v48 = vpop.xlane.xlu0 %1541  ;;  %v3782_v49 = vld [vmem:[#allocation12_spill] sm:$0xff] }
 0x287   :  { %v2004_v44 = vadd.f32 %v2003_v5, %v1941_v12  ;;  %v1879_v0 = vsub.f32 %v1623_v19, %v1815_v62  ;;  %v1880_v61 = vsub.f32 %v1624_v59, %v1816_v24  ;;  %2592 = vrcp.f32 %v1707_v35 }
 0x288   :  { %v2581_v38 = vpop.eup %2580  ;;  %2594 = vrcp.f32 %v3427_v40 }
 0x289   :  { %v2583_v9 = vpop.eup %2582  ;;  %v2005_v42 = vadd.f32 %v2004_v44, %v1942_v47  ;;  %v1943_v11 = vmul.f32 %v1879_v0, %v1879_v0  ;;  %v1817_v30 = vmul.f32 %v2581_v38, %v3128_v57  ;;  %v1818_v46 = vmul.f32 %v2581_v38, %v3150_v6 }
 0x28a   :  { %v1710_v41 = vpop.xlane.xlu1 %1709  ;;  %v1944_v54 = vmul.f32 %v1880_v61, %v1880_v61  ;;  %v1627_v40 = vmul.f32 %v2583_v9, %v2948_v29  ;;  %v1628_v39 = vmul.f32 %v2583_v9, %v2952_v32 }
 0x28b   :  { %v2006_v26 = vadd.f32 %v2005_v42, %v1943_v11  ;;  %v1881_v17 = vsub.f32 %v1625_v33, %v1817_v30  ;;  %2596 = vrcp.f32 %v1710_v41  ;;  %v1882_v18 = vsub.f32 %v1626_v14, %v1818_v46  ;;  %v3784_v33 = vld [vmem:[#allocation15_spill] sm:$0xff]  ;;  %v3786_v41 = vld [vmem:[#allocation14_spill] sm:$0xff] }
 0x28c   :  { %v2585_v16 = vpop.eup %2584  ;;  %2598 = vrcp.f32 %v3430_v36  ;;  %v3785_v14 = vld [vmem:[#allocation47_spill] sm:$0xff] }
 0x28d   :  { %v2587_v22 = vpop.eup %2586  ;;  %v2007_v2 = vadd.f32 %v2006_v26, %v1944_v54  ;;  %v1945_v57 = vmul.f32 %v1881_v17, %v1881_v17  ;;  %v1819_v20 = vmul.f32 %v2585_v16, %v3142_v51  ;;  %v1820_v6 = vmul.f32 %v2585_v16, %v3166_v3 }
 0x28e   :  { %v1946_v52 = vmul.f32 %v1882_v18, %v1882_v18  ;;  %v1713_v58 = vpop.xlane.xlu1 %1712  ;;  %v1629_v32 = vmul.f32 %v2587_v22, %v2957_v43  ;;  %v1630_v3 = vmul.f32 %v2587_v22, %v3781_v31  ;;  %v3783_v43 = vld [vmem:[#allocation13_spill] sm:$0xff] }
 0x28f   :  { %v2008_v15 = vadd.f32 %v2007_v2, %v1945_v57  ;;  %v1883_v55 = vsub.f32 %v1627_v40, %v1819_v20  ;;  %v1884_v1 = vsub.f32 %v1628_v39, %v1820_v6  ;;  %2600 = vrcp.f32 %v1713_v58  ;;  %v3788_v22 = vld [vmem:[#allocation17_spill] sm:$0xff]  ;;  %v3789_v57 = vld [vmem:[#allocation16_spill] sm:$0xff]  ;;  %v3790_v58 = vld [vmem:[#allocation50_spill] sm:$0xff] }
 0x290   :  { %v2589_v29 = vpop.eup %2588  ;;  %2602 = vrcp.f32 %v3437_v27  ;;  %v3500_v27 = vpop.xlane.xlu0 %1544 }
 0x291   :  { %v2591_v36 = vpop.eup %2590  ;;  %v2009_v13 = vadd.f32 %v2008_v15, %v1946_v52  ;;  %v1947_v53 = vmul.f32 %v1883_v55, %v1883_v55  ;;  %v1821_v51 = vmul.f32 %v2589_v29, %v3158_v60  ;;  %v1822_v4 = vmul.f32 %v2589_v29, %v3182_v21  ;;  %v3791_v55 = vld [vmem:[#allocation55_spill] sm:$0xff] }
 0x292   :  { %v1716_v50 = vpop.xlane.xlu1 %1715  ;;  %v1948_v37 = vmul.f32 %v1884_v1, %v1884_v1  ;;  %v1631_v5 = vmul.f32 %v2591_v36, %v3782_v49  ;;  %v1632_v12 = vmul.f32 %v2591_v36, %v3783_v43  ;;  %v3794_v49 = vld [vmem:[#allocation18_spill] sm:$0xff] }
 0x293   :  { %v2010_v23 = vadd.f32 %v2009_v13, %v1947_v53  ;;  %v1885_v19 = vsub.f32 %v1629_v32, %v1821_v51  ;;  %2604 = vrcp.f32 %v1716_v50  ;;  %v1886_v62 = vsub.f32 %v1630_v3, %v1822_v4  ;;  %v3792_v4 = vld [vmem:[#allocation19_spill] sm:$0xff]  ;;  %v3795_v43 = vld [vmem:[#allocation58_spill] sm:$0xff] }
 0x294   :  { %v2593_v59 = vpop.eup %2592  ;;  %2606 = vrcp.f32 %v3441_v56  ;;  %v3508_v54 = vpop.xlane.xlu0 %1547 }
 0x295   :  { %v2595_v60 = vpop.eup %2594  ;;  %v2011_v24 = vadd.f32 %v2010_v23, %v1948_v37  ;;  %v1949_v8 = vmul.f32 %v1885_v19, %v1885_v19  ;;  %v1823_v21 = vmul.f32 %v2593_v59, %v3174_v63  ;;  %v1824_v47 = vmul.f32 %v2593_v59, %v3198_v25  ;;  %v3787_v25 = vld [vmem:[#allocation51_spill] sm:$0xff]  ;;  %v3793_v19 = vld [vmem:[#allocation54_spill] sm:$0xff] }
 0x296   :  { %v1950_v35 = vmul.f32 %v1886_v62, %v1886_v62  ;;  %v1719_v44 = vpop.xlane.xlu1 %1718  ;;  %v1633_v42 = vmul.f32 %v2595_v60, %v3784_v33  ;;  %v1634_v63 = vmul.f32 %v2595_v60, %v3786_v41 }
 0x297   :  { %v2012_v0 = vadd.f32 %v2011_v24, %v1949_v8  ;;  %v1887_v61 = vsub.f32 %v1631_v5, %v1823_v21  ;;  %v1888_v38 = vsub.f32 %v1632_v12, %v1824_v47  ;;  %2608 = vrcp.f32 %v1719_v44 }
 0x298   :  { %v2597_v9 = vpop.eup %2596  ;;  %2610 = vrcp.f32 %v3452_v45  ;;  %v3517_v3 = vpop.xlane.xlu0 %1550 }
 0x299   :  { %v2599_v56 = vpop.eup %2598  ;;  %v2013_v11 = vadd.f32 %v2012_v0, %v1950_v35  ;;  %v1951_v30 = vmul.f32 %v1887_v61, %v1887_v61  ;;  %v1825_v46 = vmul.f32 %v2597_v9, %v3785_v14  ;;  %v1826_v26 = vmul.f32 %v2597_v9, %v3787_v25  ;;  %v3797_v35 = vld [vmem:[#allocation20_spill] sm:$0xff]  ;;  %v3798_v9 = vld [vmem:[#allocation61_spill] sm:$0xff] }
 0x29a   :  { %v1722_v17 = vpop.xlane.xlu1 %1721  ;;  %v1952_v16 = vmul.f32 %v1888_v38, %v1888_v38  ;;  %v1635_v2 = vmul.f32 %v2599_v56, %v3788_v22  ;;  %v1636_v45 = vmul.f32 %v2599_v56, %v3789_v57 }
 0x29b   :  { %v2014_v40 = vadd.f32 %v2013_v11, %v1951_v30  ;;  %v1889_v39 = vsub.f32 %v1633_v42, %v1825_v46  ;;  %2612 = vrcp.f32 %v1722_v17  ;;  %v1890_v20 = vsub.f32 %v1634_v63, %v1826_v26  ;;  %v3799_v42 = vld [vmem:[#allocation62_spill] sm:$0xff] }
 0x29c   :  { %v2601_v18 = vpop.eup %2600  ;;  %2614 = vrcp.f32 %v3462_v34  ;;  %v3528_v30 = vpop.xlane.xlu0 %1553  ;;  %v3800_v17 = vld [vmem:[#allocation22_spill] sm:$0xff] }
 0x29d   :  { %v2015_v6 = vadd.f32 %v2014_v40, %v1952_v16  ;;  %v1953_v52 = vmul.f32 %v1889_v39, %v1889_v39  ;;  %v1827_v15 = vmul.f32 %v2601_v18, %v3790_v58  ;;  %v1828_v1 = vmul.f32 %v2601_v18, %v3791_v55  ;;  %v2603_v29 = vpop.eup %2602  ;;  %v3801_v18 = vld [vmem:[#allocation64_spill] sm:$0xff] }
 0x29e   :  { %v1954_v32 = vmul.f32 %v1890_v20, %v1890_v20  ;;  %v1725_v36 = vpop.xlane.xlu1 %1724  ;;  %v1637_v50 = vmul.f32 %v2603_v29, %v3792_v4  ;;  %v1638_v5 = vmul.f32 %v2603_v29, %v3794_v49 }
 0x29f   :  { %v2016_v13 = vadd.f32 %v2015_v6, %v1953_v52  ;;  %v1891_v53 = vsub.f32 %v1635_v2, %v1827_v15  ;;  %v1892_v51 = vsub.f32 %v1636_v45, %v1828_v1  ;;  %2616 = vrcp.f32 %v1725_v36  ;;  %v3802_v2 = vld [vmem:[#allocation23_spill] sm:$0xff]  ;;  %v3803_v45 = vld [vmem:[#allocation65_spill] sm:$0xff]  ;;  %v3804_v1 = vld [vmem:[#allocation24_spill] sm:$0xff] }
 0x2a0   :  { %v2605_v31 = vpop.eup %2604  ;;  %2618 = vrcp.f32 %v3470_v28  ;;  %v3796_v28 = vld [vmem:[#allocation21_spill] sm:$0xff]  ;;  %v1557_v36 = vpop.xlane.xlu0 %1556 }
 0x2a1   :  { %v2607_v34 = vpop.eup %2606  ;;  %v2017_v37 = vadd.f32 %v2016_v13, %v1954_v32  ;;  %v1955_v23 = vmul.f32 %v1891_v53, %v1891_v53  ;;  %v1829_v59 = vmul.f32 %v2605_v31, %v3793_v19  ;;  %v1830_v12 = vmul.f32 %v2605_v31, %v3795_v43 }
 0x2a2   :  { %v1728_v62 = vpop.xlane.xlu1 %1727  ;;  %v1956_v60 = vmul.f32 %v1892_v51, %v1892_v51  ;;  %v1639_v47 = vmul.f32 %v2607_v34, %v3796_v28  ;;  %v1640_v44 = vmul.f32 %v2607_v34, %v3797_v35  ;;  %v3806_v34 = vld [vmem:[#allocation66_spill] sm:$0xff]  ;;  %v3810_v28 = vld [vmem:[#allocation28_spill] sm:$0xff] }
 0x2a3   :  { %v2018_v24 = vadd.f32 %v2017_v37, %v1955_v23  ;;  %v1893_v8 = vsub.f32 %v1637_v50, %v1829_v59  ;;  %2620 = vrcp.f32 %v1728_v62  ;;  %v1894_v0 = vsub.f32 %v1638_v5, %v1830_v12  ;;  %v3807_v50 = vld [vmem:[#allocation67_spill] sm:$0xff]  ;;  %v3808_v12 = vld [vmem:[#allocation25_spill] sm:$0xff] }
 0x2a4   :  { %v2609_v21 = vpop.eup %2608  ;;  %2622 = vrcp.f32 %v3479_v7  ;;  %v1560_v35 = vpop.xlane.xlu0 %1559 }
 0x2a5   :  { %v2019_v61 = vadd.f32 %v2018_v24, %v1956_v60  ;;  %v1957_v38 = vmul.f32 %v1893_v8, %v1893_v8  ;;  %v1831_v33 = vmul.f32 %v2609_v21, %v3798_v9  ;;  %v1832_v56 = vmul.f32 %v2609_v21, %v3799_v42  ;;  %v2611_v11 = vpop.eup %2610  ;;  %v3809_v8 = vld [vmem:[#allocation68_spill] sm:$0xff] }
 0x2a6   :  { %v1958_v14 = vmul.f32 %v1894_v0, %v1894_v0  ;;  %v1731_v46 = vpop.xlane.xlu1 %1730  ;;  %v1641_v16 = vmul.f32 %v2611_v11, %v3800_v17  ;;  %v1642_v57 = vmul.f32 %v2611_v11, %v3802_v2  ;;  %v3815_v17 = vld [vmem:[#allocation71_spill] sm:$0xff] }
 0x2a7   :  { %v2020_v41 = vadd.f32 %v2019_v61, %v1957_v38  ;;  %v1895_v63 = vsub.f32 %v1639_v47, %v1831_v33  ;;  %v1896_v25 = vsub.f32 %v1640_v44, %v1832_v56  ;;  %2624 = vrcp.f32 %v1731_v46  ;;  %v3811_v44 = vld [vmem:[#allocation69_spill] sm:$0xff]  ;;  %v3812_v56 = vld [vmem:[#allocation27_spill] sm:$0xff] }
 0x2a8   :  { %v2613_v26 = vpop.eup %2612  ;;  %2626 = vrcp.f32 %v3490_v48  ;;  %v3805_v48 = vld [vmem:[#allocation26_spill] sm:$0xff] }
 0x2a9   :  { %v2615_v7 = vpop.eup %2614  ;;  %v2021_v40 = vadd.f32 %v2020_v41, %v1958_v14  ;;  %v1959_v39 = vmul.f32 %v1895_v63, %v1895_v63  ;;  %v1833_v22 = vmul.f32 %v2613_v26, %v3801_v18  ;;  %v1834_v20 = vmul.f32 %v2613_v26, %v3803_v45  ;;  %v3813_v14 = vld [vmem:[#allocation30_spill] sm:$0xff]  ;;  %v3816_v45 = vld [vmem:[#allocation29_spill] sm:$0xff] }
 0x2aa   :  { %v1734_v6 = vpop.xlane.xlu1 %1733  ;;  %v1960_v52 = vmul.f32 %v1896_v25, %v1896_v25  ;;  %v1643_v29 = vmul.f32 %v2615_v7, %v3804_v1  ;;  %v1644_v32 = vmul.f32 %v2615_v7, %v3805_v48  ;;  %v3814_v26 = vld [vmem:[#allocation70_spill] sm:$0xff]  ;;  %v3818_v1 = vld [vmem:[#allocation32_spill] sm:$0xff]  ;;  %v3819_v48 = vld [vmem:[#allocation73_spill] sm:$0xff] }
 0x2ab   :  { %v2022_v58 = vadd.f32 %v2021_v40, %v1959_v39  ;;  %v1897_v15 = vsub.f32 %v1641_v16, %v1833_v22  ;;  %2628 = vrcp.f32 %v1734_v6  ;;  %v1898_v13 = vsub.f32 %v1642_v57, %v1834_v20  ;;  %v1563_v6 = vpop.xlane.xlu0 %1562 }
 0x2ac   :  { %v2617_v55 = vpop.eup %2616  ;;  %2630 = vrcp.f32 %v3500_v27 }
 0x2ad   :  { %v2619_v53 = vpop.eup %2618  ;;  %v2023_v51 = vadd.f32 %v2022_v58, %v1960_v52  ;;  %v1961_v31 = vmul.f32 %v1897_v15, %v1897_v15  ;;  %v1835_v4 = vmul.f32 %v2617_v55, %v3806_v34  ;;  %v1836_v37 = vmul.f32 %v2617_v55, %v3807_v50  ;;  %v3817_v15 = vld [vmem:[#allocation72_spill] sm:$0xff] }
 0x2ae   :  { %v1962_v23 = vmul.f32 %v1898_v13, %v1898_v13  ;;  %v1737_v19 = vpop.xlane.xlu1 %1736  ;;  %v1645_v62 = vmul.f32 %v2619_v53, %v3808_v12  ;;  %v1646_v47 = vmul.f32 %v2619_v53, %v3810_v28 }
 0x2af   :  { %v2024_v59 = vadd.f32 %v2023_v51, %v1961_v31  ;;  %v1899_v49 = vsub.f32 %v1643_v29, %v1835_v4  ;;  %v1900_v5 = vsub.f32 %v1644_v32, %v1836_v37  ;;  %2632 = vrcp.f32 %v1737_v19  ;;  %v3820_v4 = vld [vmem:[#allocation31_spill] sm:$0xff]  ;;  %v3821_v37 = vld [vmem:[#allocation34_spill] sm:$0xff] }
 0x2b0   :  { %v2621_v43 = vpop.eup %2620  ;;  %2634 = vrcp.f32 %v3508_v54 }
 0x2b1   :  { %v2623_v60 = vpop.eup %2622  ;;  %v2025_v27 = vadd.f32 %v2024_v59, %v1962_v23  ;;  %v1963_v24 = vmul.f32 %v1899_v49, %v1899_v49  ;;  %v1837_v21 = vmul.f32 %v2621_v43, %v3809_v8  ;;  %v1838_v0 = vmul.f32 %v2621_v43, %v3811_v44  ;;  %v3822_v49 = vld [vmem:[#allocation74_spill] sm:$0xff]  ;;  %v3823_v43 = vld [vmem:[#allocation75_spill] sm:$0xff] }
 0x2b2   :  { %v1740_v61 = vpop.xlane.xlu1 %1739  ;;  %v1964_v38 = vmul.f32 %v1900_v5, %v1900_v5  ;;  %v1647_v11 = vmul.f32 %v2623_v60, %v3812_v56  ;;  %v1648_v46 = vmul.f32 %v2623_v60, %v3813_v14  ;;  %v1566_v60 = vpop.xlane.xlu0 %1565 }
 0x2b3   :  { %v2026_v9 = vadd.f32 %v2025_v27, %v1963_v24  ;;  %v1901_v33 = vsub.f32 %v1645_v62, %v1837_v21  ;;  %2636 = vrcp.f32 %v1740_v61  ;;  %v1902_v54 = vsub.f32 %v1646_v47, %v1838_v0  ;;  %v3824_v0 = vld [vmem:[#allocation33_spill] sm:$0xff] }
 0x2b4   :  { %v2625_v42 = vpop.eup %2624  ;;  %2638 = vrcp.f32 %v3517_v3 }
 0x2b5   :  { %v2627_v41 = vpop.eup %2626  ;;  %v2027_v63 = vadd.f32 %v2026_v9, %v1964_v38  ;;  %v1965_v25 = vmul.f32 %v1901_v33, %v1901_v33  ;;  %v1839_v7 = vmul.f32 %v2625_v42, %v3814_v26  ;;  %v1840_v16 = vmul.f32 %v2625_v42, %v3815_v17  ;;  %v3825_v9 = vld [vmem:[#allocation76_spill] sm:$0xff]  ;;  %v3828_v26 = vld [vmem:[#allocation35_spill] sm:$0xff] }
 0x2b6   :  { %v1966_v40 = vmul.f32 %v1902_v54, %v1902_v54  ;;  %v1743_v39 = vpop.xlane.xlu1 %1742  ;;  %v1649_v20 = vmul.f32 %v2627_v41, %v3816_v45  ;;  %v1650_v29 = vmul.f32 %v2627_v41, %v3818_v1  ;;  %v3826_v42 = vld [vmem:[#allocation36_spill] sm:$0xff] }
 0x2b7   :  { %v2028_v18 = vadd.f32 %v2027_v63, %v1965_v25  ;;  %v1903_v22 = vsub.f32 %v1647_v11, %v1839_v7  ;;  %v1904_v2 = vsub.f32 %v1648_v46, %v1840_v16  ;;  %2640 = vrcp.f32 %v1743_v39  ;;  %v3827_v11 = vld [vmem:[#allocation77_spill] sm:$0xff]  ;;  %v1569_v16 = vpop.xlane.xlu0 %1568 }
 0x2b8   :  { %v2629_v57 = vpop.eup %2628  ;;  %2642 = vrcp.f32 %v3528_v30 }
 0x2b9   :  { %v2631_v52 = vpop.eup %2630  ;;  %v2029_v3 = vadd.f32 %v2028_v18, %v1966_v40  ;;  %v1967_v58 = vmul.f32 %v1903_v22, %v1903_v22  ;;  %v1841_v55 = vmul.f32 %v2629_v57, %v3817_v15  ;;  %v1842_v32 = vmul.f32 %v2629_v57, %v3819_v48  ;;  %v3830_v22 = vld [vmem:[#allocation78_spill] sm:$0xff]  ;;  %v3831_v57 = vld [vmem:[#allocation79_spill] sm:$0xff]  ;;  %v3832_v48 = vld [vmem:[#allocation37_spill] sm:$0xff] }
 0x2ba   :  { %v1746_v13 = vpop.xlane.xlu1 %1745  ;;  %v1968_v53 = vmul.f32 %v1904_v2, %v1904_v2  ;;  %v1651_v50 = vmul.f32 %v2631_v52, %v3820_v4  ;;  %v1652_v23 = vmul.f32 %v2631_v52, %v3821_v37 }
 0x2bb   :  { %v2030_v51 = vadd.f32 %v2029_v3, %v1967_v58  ;;  %v1905_v31 = vsub.f32 %v1649_v20, %v1841_v55  ;;  %2644 = vrcp.f32 %v1746_v13  ;;  %v1906_v30 = vsub.f32 %v1650_v29, %v1842_v32  ;;  %v1572_v4 = vpop.xlane.xlu0 %1571 }
 0x2bc   :  { %v2633_v34 = vpop.eup %2632  ;;  %2646 = vrcp.f32 %v1557_v36 }
 0x2bd   :  { %v2031_v19 = vadd.f32 %v2030_v51, %v1968_v53  ;;  %v1969_v59 = vmul.f32 %v1905_v31, %v1905_v31  ;;  %v1843_v5 = vmul.f32 %v2633_v34, %v3822_v49  ;;  %v1844_v12 = vmul.f32 %v2633_v34, %v3823_v43  ;;  %v2635_v62 = vpop.eup %2634  ;;  %v3833_v53 = vld [vmem:[#allocation80_spill] sm:$0xff] }
 0x2be   :  { %v1970_v27 = vmul.f32 %v1906_v30, %v1906_v30  ;;  %v1749_v24 = vpop.xlane.xlu1 %1748  ;;  %v1653_v36 = vmul.f32 %v2635_v62, %v3824_v0  ;;  %v1654_v56 = vmul.f32 %v2635_v62, %v3826_v42  ;;  %v3834_v31 = vld [vmem:[#allocation40_spill] sm:$0xff]  ;;  %v3840_v42 = vld [vmem:[#allocation41_spill] sm:$0xff] }
 0x2bf   :  { %v2032_v8 = vadd.f32 %v2031_v19, %v1969_v59  ;;  %v1907_v21 = vsub.f32 %v1651_v50, %v1843_v5  ;;  %v1908_v28 = vsub.f32 %v1652_v23, %v1844_v12  ;;  %2648 = vrcp.f32 %v1749_v24  ;;  %v3835_v50 = vld [vmem:[#allocation81_spill] sm:$0xff]  ;;  %v3836_v5 = vld [vmem:[#allocation39_spill] sm:$0xff]  ;;  %v3837_v12 = vld [vmem:[#allocation42_spill] sm:$0xff] }
 0x2c0   :  { %v2637_v47 = vpop.eup %2636  ;;  %2650 = vrcp.f32 %v1560_v35  ;;  %v3829_v35 = vld [vmem:[#allocation38_spill] sm:$0xff] }
 0x2c1   :  { %v2639_v44 = vpop.eup %2638  ;;  %v2033_v61 = vadd.f32 %v2032_v8, %v1970_v27  ;;  %v1971_v38 = vmul.f32 %v1907_v21, %v1907_v21  ;;  %v1845_v33 = vmul.f32 %v2637_v47, %v3825_v9  ;;  %v1846_v14 = vmul.f32 %v2637_v47, %v3827_v11  ;;  %v3838_v21 = vld [vmem:[#allocation82_spill] sm:$0xff]  ;;  %v3839_v47 = vld [vmem:[#allocation83_spill] sm:$0xff]  ;;  %v1575_v11 = vpop.xlane.xlu0 %1574 }
 0x2c2   :  { %v1752_v46 = vpop.xlane.xlu1 %1751  ;;  %v1972_v54 = vmul.f32 %v1908_v28, %v1908_v28  ;;  %v1655_v7 = vmul.f32 %v2639_v44, %v3828_v26  ;;  %v1656_v17 = vmul.f32 %v2639_v44, %v3829_v35  ;;  %v3842_v26 = vld [vmem:[#allocation84_spill] sm:$0xff] }
 0x2c3   :  { %v2034_v41 = vadd.f32 %v2033_v61, %v1971_v38  ;;  %v1909_v63 = vsub.f32 %v1653_v36, %v1845_v33  ;;  %2652 = vrcp.f32 %v1752_v46  ;;  %v1910_v40 = vsub.f32 %v1654_v56, %v1846_v14 }
 0x2c4   :  { %v2641_v25 = vpop.eup %2640  ;;  %2654 = vrcp.f32 %v1563_v6 }
 0x2c5   :  { %v2035_v39 = vadd.f32 %v2034_v41, %v1972_v54  ;;  %v1973_v18 = vmul.f32 %v1909_v63, %v1909_v63  ;;  %v1847_v2 = vmul.f32 %v2641_v25, %v3830_v22  ;;  %v1848_v45 = vmul.f32 %v2641_v25, %v3831_v57  ;;  %v2643_v20 = vpop.eup %2642  ;;  %v3841_v63 = vld [vmem:[#allocation44_spill] sm:$0xff] }
 0x2c6   :  { %v1974_v52 = vmul.f32 %v1910_v40, %v1910_v40  ;;  %v1755_v3 = vpop.xlane.xlu1 %1754  ;;  %v1657_v6 = vmul.f32 %v2643_v20, %v3832_v48  ;;  %v1658_v34 = vmul.f32 %v2643_v20, %v3834_v31 }
 0x2c7   :  { %v2036_v58 = vadd.f32 %v2035_v39, %v1973_v18  ;;  %v1911_v15 = vsub.f32 %v1655_v7, %v1847_v2  ;;  %v1912_v55 = vsub.f32 %v1656_v17, %v1848_v45  ;;  %2656 = vrcp.f32 %v1755_v3  ;;  %v3843_v18 = vld [vmem:[#allocation43_spill] sm:$0xff]  ;;  %v3844_v2 = vld [vmem:[#allocation46_spill] sm:$0xff] }
 0x2c8   :  { %v2645_v1 = vpop.eup %2644  ;;  %2658 = vrcp.f32 %v1566_v60 }
 0x2c9   :  { %v2647_v29 = vpop.eup %2646  ;;  %v2037_v32 = vadd.f32 %v2036_v58, %v1974_v52  ;;  %v1975_v13 = vmul.f32 %v1911_v15, %v1911_v15  ;;  %v1849_v51 = vmul.f32 %v2645_v1, %v3833_v53  ;;  %v1850_v37 = vmul.f32 %v2645_v1, %v3835_v50  ;;  %v3846_v15 = vld [vmem:[#allocation86_spill] sm:$0xff]  ;;  %v1578_v1 = vpop.xlane.xlu0 %1577 }
 0x2ca   :  { %v1758_v23 = vpop.xlane.xlu1 %1757  ;;  %v1976_v30 = vmul.f32 %v1912_v55, %v1912_v55  ;;  %v1659_v43 = vmul.f32 %v2647_v29, %v3836_v5  ;;  %v1660_v62 = vmul.f32 %v2647_v29, %v3837_v12 }
 0x2cb   :  { %v2038_v19 = vadd.f32 %v2037_v32, %v1975_v13  ;;  %v1913_v59 = vsub.f32 %v1657_v6, %v1849_v51  ;;  %2660 = vrcp.f32 %v1758_v23  ;;  %v1914_v60 = vsub.f32 %v1658_v34, %v1850_v37  ;;  %v3847_v51 = vld [vmem:[#allocation45_spill] sm:$0xff]  ;;  %v3848_v37 = vld [vmem:[#allocation87_spill] sm:$0xff] }
 0x2cc   :  { %v2649_v49 = vpop.eup %2648  ;;  %2662 = vrcp.f32 %v1569_v16 }
 0x2cd   :  { %v2651_v27 = vpop.eup %2650  ;;  %v2039_v24 = vadd.f32 %v2038_v19, %v1976_v30  ;;  %v1977_v8 = vmul.f32 %v1913_v59, %v1913_v59  ;;  %v1851_v28 = vmul.f32 %v2649_v49, %v3838_v21  ;;  %v1852_v44 = vmul.f32 %v2649_v49, %v3839_v47  ;;  %v3849_v30 = vld [vmem:[#allocation48_spill] sm:$0xff] }
 0x2ce   :  { %v1978_v0 = vmul.f32 %v1914_v60, %v1914_v60  ;;  %v1761_v36 = vpop.xlane.xlu1 %1760  ;;  %v1661_v56 = vmul.f32 %v2651_v27, %v3840_v42  ;;  %v1662_v25 = vmul.f32 %v2651_v27, %v3841_v63  ;;  %v3850_v59 = vld [vmem:[#allocation88_spill] sm:$0xff]  ;;  %v3851_v27 = vld [vmem:[#allocation49_spill] sm:$0xff] }
 0x2cf   :  { %v2040_v61 = vadd.f32 %v2039_v24, %v1977_v8  ;;  %v1915_v38 = vsub.f32 %v1659_v43, %v1851_v28  ;;  %v1916_v9 = vsub.f32 %v1660_v62, %v1852_v44  ;;  %2664 = vrcp.f32 %v1761_v36  ;;  %v3852_v8 = vld [vmem:[#allocation52_spill] sm:$0xff] }
 0x2d0   :  { %v2653_v33 = vpop.eup %2652  ;;  %2666 = vrcp.f32 %v1572_v4 }
 0x2d1   :  { %v2655_v14 = vpop.eup %2654  ;;  %v2041_v46 = vadd.f32 %v2040_v61, %v1978_v0  ;;  %v1979_v54 = vmul.f32 %v1915_v38, %v1915_v38  ;;  %v1853_v41 = vmul.f32 %v2653_v33, %v3356_v10  ;;  %v1854_v7 = vmul.f32 %v2653_v33, %v3842_v26  ;;  %v3845_v10 = vld [vmem:[#allocation85_spill] sm:$0xff]  ;;  %v3854_v61 = vld [vmem:[#allocation90_spill] sm:$0xff]  ;;  %v3856_v26 = vld [vmem:[#allocation91_spill] sm:$0xff] }
 0x2d2   :  { %v1764_v35 = vpop.xlane.xlu1 %1763  ;;  %v1980_v17 = vmul.f32 %v1916_v9, %v1916_v9  ;;  %v1663_v22 = vmul.f32 %v2655_v14, %v3843_v18  ;;  %v1664_v57 = vmul.f32 %v2655_v14, %v3844_v2  ;;  %v3853_v0 = vld [vmem:[#allocation89_spill] sm:$0xff] }
 0x2d3   :  { %v2042_v16 = vadd.f32 %v2041_v46, %v1979_v54  ;;  %v1917_v40 = vsub.f32 %v1661_v56, %v1853_v41  ;;  %2668 = vrcp.f32 %v1764_v35  ;;  %v1918_v45 = vsub.f32 %v1662_v25, %v1854_v7  ;;  %v3855_v54 = vld [vmem:[#allocation53_spill] sm:$0xff]  ;;  %v3857_v35 = vld [vmem:[#allocation56_spill] sm:$0xff] }
 0x2d4   :  { %v2657_v39 = vpop.eup %2656  ;;  %2670 = vrcp.f32 %v1575_v11 }
 0x2d5   :  { %v2659_v20 = vpop.eup %2658  ;;  %v2043_v52 = vadd.f32 %v2042_v16, %v1980_v17  ;;  %v1981_v3 = vmul.f32 %v1917_v40, %v1917_v40  ;;  %v1855_v58 = vmul.f32 %v2657_v39, %v3845_v10  ;;  %v1856_v55 = vmul.f32 %v2657_v39, %v3846_v15  ;;  %v3858_v16 = vld [vmem:[#allocation92_spill] sm:$0xff]  ;;  %v3861_v10 = vld [vmem:[#allocation94_spill] sm:$0xff] }
 0x2d6   :  { %v1982_v29 = vmul.f32 %v1918_v45, %v1918_v45  ;;  %v1767_v48 = vpop.xlane.xlu1 %1766  ;;  %v1665_v31 = vmul.f32 %v2659_v20, %v3847_v51  ;;  %v1666_v19 = vmul.f32 %v2659_v20, %v3849_v30 }
 0x2d7   :  { %v2044_v6 = vadd.f32 %v2043_v52, %v1981_v3  ;;  %v1919_v32 = vsub.f32 %v1663_v22, %v1855_v58  ;;  %v1920_v13 = vsub.f32 %v1664_v57, %v1856_v55  ;;  %2672 = vrcp.f32 %v1767_v48  ;;  %v3859_v57 = vld [vmem:[#allocation57_spill] sm:$0xff] }
 0x2d8   :  { %v2661_v53 = vpop.eup %2660  ;;  %2674 = vrcp.f32 %v1578_v1  ;;  %v3860_v52 = vld [vmem:[#allocation93_spill] sm:$0xff] }
 0x2d9   :  { %v2663_v34 = vpop.eup %2662  ;;  %v2045_v4 = vadd.f32 %v2044_v6, %v1982_v29  ;;  %v1983_v50 = vmul.f32 %v1919_v32, %v1919_v32  ;;  %v1857_v23 = vmul.f32 %v2661_v53, %v3848_v37  ;;  %v1858_v49 = vmul.f32 %v2661_v53, %v3850_v59  ;;  %v3862_v29 = vld [vmem:[#allocation59_spill] sm:$0xff]  ;;  %v3865_v37 = vld [vmem:[#allocation96_spill] sm:$0xff] }
 0x2da   :  { %v1770_v5 = vpop.xlane.xlu1 %1769  ;;  %v1984_v43 = vmul.f32 %v1920_v13, %v1920_v13  ;;  %v1667_v24 = vmul.f32 %v2663_v34, %v3851_v27  ;;  %v1668_v21 = vmul.f32 %v2663_v34, %v3852_v8 }
 0x2db   :  { %v2046_v12 = vadd.f32 %v2045_v4, %v1983_v50  ;;  %v1921_v62 = vsub.f32 %v1665_v31, %v1857_v23  ;;  %2676 = vrcp.f32 %v1770_v5  ;;  %v1922_v28 = vsub.f32 %v1666_v19, %v1858_v49  ;;  %v3863_v31 = vld [vmem:[#allocation60_spill] sm:$0xff]  ;;  %v3864_v4 = vld [vmem:[#allocation95_spill] sm:$0xff] }
 0x2dc   :  { %v2665_v60 = vpop.eup %2664  ;;  %v3866_v19 = vld [vmem:[#allocation63_spill] sm:$0xff] }
 0x2dd   :  { %v2047_v47 = vadd.f32 %v2046_v12, %v1984_v43  ;;  %v1985_v44 = vmul.f32 %v1921_v62, %v1921_v62  ;;  %v1859_v36 = vmul.f32 %v2665_v60, %v3853_v0  ;;  %v1860_v38 = vmul.f32 %v2665_v60, %v3854_v61  ;;  %v2667_v9 = vpop.eup %2666 }
 0x2de   :  { %v1986_v33 = vmul.f32 %v1922_v28, %v1922_v28  ;;  %v1669_v41 = vmul.f32 %v2667_v9, %v3855_v54  ;;  %v1670_v17 = vmul.f32 %v2667_v9, %v3857_v35 }
 0x2df   :  { %v2048_v42 = vadd.f32 %v2047_v47, %v1985_v44  ;;  %v1923_v56 = vsub.f32 %v1667_v24, %v1859_v36  ;;  %v1924_v11 = vsub.f32 %v1668_v21, %v1860_v38 }
 0x2e0   :  { %v2669_v14 = vpop.eup %2668 }
 0x2e1   :  { %v2671_v46 = vpop.eup %2670  ;;  %v2049_v63 = vadd.f32 %v2048_v42, %v1986_v33  ;;  %v1987_v25 = vmul.f32 %v1923_v56, %v1923_v56  ;;  %v1861_v7 = vmul.f32 %v2669_v14, %v3856_v26  ;;  %v1862_v40 = vmul.f32 %v2669_v14, %v3858_v16 }
 0x2e2   :  { %v1988_v39 = vmul.f32 %v1924_v11, %v1924_v11  ;;  %v1671_v45 = vmul.f32 %v2671_v46, %v3859_v57  ;;  %v1672_v48 = vmul.f32 %v2671_v46, %v3862_v29 }
 0x2e3   :  { %v1925_v18 = vsub.f32 %v1669_v41, %v1861_v7  ;;  %v2050_v22 = vadd.f32 %v2049_v63, %v1987_v25  ;;  %v1926_v20 = vsub.f32 %v1670_v17, %v1862_v40 }
 0x2e4   :  { %v2673_v2 = vpop.eup %2672 }
 0x2e5   :  { %v1863_v3 = vmul.f32 %v2673_v2, %v3860_v52  ;;  %v1864_v58 = vmul.f32 %v2673_v2, %v3861_v10  ;;  %v1989_v15 = vmul.f32 %v1925_v18, %v1925_v18  ;;  %v2051_v55 = vadd.f32 %v2050_v22, %v1988_v39  ;;  %v2675_v1 = vpop.eup %2674 }
 0x2e6   :  { %v1990_v51 = vmul.f32 %v1926_v20, %v1926_v20  ;;  %v1673_v34 = vmul.f32 %v2675_v1, %v3863_v31  ;;  %v1674_v59 = vmul.f32 %v2675_v1, %v3866_v19 }
 0x2e7   :  { %v1927_v6 = vsub.f32 %v1671_v45, %v1863_v3  ;;  %v2052_v32 = vadd.f32 %v2051_v55, %v1989_v15  ;;  %v1928_v53 = vsub.f32 %v1672_v48, %v1864_v58 }
 0x2e8   :  { %v2677_v13 = vpop.eup %2676 }
 0x2e9   :  { %v1865_v50 = vmul.f32 %v2677_v13, %v3864_v4  ;;  %v1866_v23 = vmul.f32 %v2677_v13, %v3865_v37  ;;  %v1991_v30 = vmul.f32 %v1927_v6, %v1927_v6  ;;  %v2053_v49 = vadd.f32 %v2052_v32, %v1990_v51 }
 0x2ea   :  { %v1992_v12 = vmul.f32 %v1928_v53, %v1928_v53 }
 0x2eb   :  { %v1929_v5 = vsub.f32 %v1673_v34, %v1865_v50  ;;  %v1930_v43 = vsub.f32 %v1674_v59, %v1866_v23  ;;  %v2054_v62 = vadd.f32 %v2053_v49, %v1991_v30 }
 0x2ed   :  { %v1993_v60 = vmul.f32 %v1929_v5, %v1929_v5  ;;  %v2055_v27 = vadd.f32 %v2054_v62, %v1992_v12  ;;  %v1994_v24 = vmul.f32 %v1930_v43, %v1930_v43 }
 0x2ef   :  { %v2056_v8 = vadd.f32 %v2055_v27, %v1993_v60 }
 0x2f1   :  { %v2057_v21 = vadd.f32 %v2056_v8, %v1994_v24 }
 0x2f3   :  { %2058 = vadd.xlane.f32.xlu0 %v2057_v21 }
 0x37c   :  { %v2059_v28 = vpop.xlane.xlu0 %2058 }
 0x37d   :  { %v2060_v47 = vrot.slane %v2059_v28, 4 }
 0x37f   :  { %v2061_v44 = vadd.f32 %v2060_v47, %v2059_v28 }
 0x381   :  { %v2062_v0 = vrot.slane %v2061_v44, 2 }
 0x383   :  { %v2063_v36 = vadd.f32 %v2062_v0, %v2061_v44 }
 0x385   :  { %v2064_v61 = vrot.slane %v2063_v36, 1 }
 0x387   :  { %v2065_v38 = vadd.f32 %v2064_v61, %v2063_v36 }
 0x389   :  { %2280 = vpush %v2065_v38 }
 0x3ba   :  { %s2281_s0 = spop %2280 }
 0x3bb   :  { %2068 = sst [smem:[#allocation7]] %s2281_s0 }
 0x3bc   :  { %2076 = dma.smem_to_hbm %s2735_s1, 16, %s3608_s2, [#allocation4]  }
 0x3bd   :  { %2730 = dma.done.wait [#allocation4], 16  }
 0x3be   :  { %2731 = vsyncadd [#allocation4], 4294967280 }
 0x3bf   :  { %2080 = sfence }
 0x3c0   :  { %2081 = vsyncpa [#allocation3], 1 }
 0x3c1   :  { %2082 = vsyncpa [#allocation6], 1 }
 0x3c2   :  { %2083 = vsyncpa [#allocation4], 1 }

</bundles_post_ra>
